<compile_context>
chip_gen: v5e
topology: v5e:2x2
jax: 0.10.0
libtpu: 0.0.40
codegen_flags: <defaults>
</compile_context>

<pallas_src>
import functools

import numpy as np

import jax
import jax.numpy as jnp
from jax.experimental import pallas as pl
from jax.experimental.pallas import tpu as pltpu

_APPROX_RECIP = True


# --------------------------------------------------------------------------
# Host-side precomputed spatial operators / masks (geometry constants only)
# --------------------------------------------------------------------------
def _bilinear_matrix(n_in, n_out):
    """1-D bilinear resize operator R (n_out, n_in), align_corners=True."""
    R = np.zeros((n_out, n_in), np.float32)
    if n_out == 1 or n_in == 1:
        R[:, 0] = 1.0
        return R
    scale = (n_in - 1) / (n_out - 1)
    for i in range(n_out):
        pos = i * scale
        p0 = min(int(np.floor(pos)), n_in - 1)
        p1 = min(p0 + 1, n_in - 1)
        w = pos - p0
        R[i, p0] += 1.0 - w
        R[i, p1] += w
    return R


def _avgpool_matrix_1d(n_in):
    """1-D operator for AvgPool(k=3, stride=2, pad=1, count_include_pad=False)."""
    n_out = (n_in + 2 - 3) // 2 + 1
    P = np.zeros((n_out, n_in), np.float32)
    for i in range(n_out):
        lo = max(0, 2 * i - 1)
        hi = min(n_in - 1, 2 * i + 1)
        P[i, lo:hi + 1] = 1.0 / (hi - lo + 1)
    return P


def _spatial_operator(Ry, Rx):
    """Flattened operator A s.t. out_flat = in_flat @ A (row-major h*W+w)."""
    Ho, Hi = Ry.shape
    Wo, Wi = Rx.shape
    A = np.einsum("ip,jq->pqij", Ry, Rx).reshape(Hi * Wi, Ho * Wo)
    return A.astype(np.float32)


def _tap_masks(N, H, W, C):
    """(9*C, N*H*W) 0/1 masks killing h-/w-wrap (incl. image seam) per conv tap."""
    idx = np.arange(N * H * W)
    h = (idx // W) % H
    w = idx % W
    rows = []
    for dh in (-1, 0, 1):
        for dw in (-1, 0, 1):
            ok = ((h + dh >= 0) & (h + dh < H) &
                  (w + dw >= 0) & (w + dw < W)).astype(np.float32)
            rows.append(np.repeat(ok[None, :], C, axis=0))
    return np.concatenate(rows, axis=0)


def _build_constants(N, H, W, Cu):
    Hp = (H + 2 - 3) // 2 + 1
    Wp = (W + 2 - 3) // 2 + 1
    # per-image avg-pool operator (HW, Hp*Wp)
    A_pool = _spatial_operator(_avgpool_matrix_1d(H), _avgpool_matrix_1d(W))
    # UpsamplingBilinear2d(x2) composed with F.interpolate(size=(H,W), align_corners=True)
    Ry = _bilinear_matrix(2 * Hp, H) @ _bilinear_matrix(Hp, 2 * Hp)   # (H, Hp)
    Rx = _bilinear_matrix(2 * Wp, W) @ _bilinear_matrix(Wp, 2 * Wp)   # (W, Wp)
    A_res = _spatial_operator(Ry, Rx)                                 # (Hp*Wp, HW)
    # block-diagonal over the batch (images are concatenated along lanes)
    eye = np.eye(N, dtype=np.float32)
    A_pool_bd = np.kron(eye, A_pool)       # (N*HW,  N*HWp)
    A_res_bd = np.kron(eye, A_res)         # (N*HWp, N*HW)
    tm_hi = _tap_masks(N, H, W, Cu)        # (9Cu, N*HW)
    tm_lo = _tap_masks(N, Hp, Wp, Cu)      # (9Cu, N*HWp)
    return (jnp.asarray(A_pool_bd), jnp.asarray(A_res_bd),
            jnp.asarray(tm_hi), jnp.asarray(tm_lo), Hp, Wp)


def _pack_params(params, Cu):
    """Pack 4 MaskBlocks into an affine slab (4,3,Cu,1) and weight slab (4,Cu,9Cu)."""
    blocks = list(params["trunk"]) + list(params["mask"])
    affs, wms = [], []
    for scale, bias, w, b in blocks:
        cin = scale.shape[0]
        cout = b.shape[0]
        sc = jnp.zeros((Cu,), jnp.float32).at[:cin].set(scale.astype(jnp.float32))
        bs = jnp.zeros((Cu,), jnp.float32).at[:cin].set(bias.astype(jnp.float32))
        cb = jnp.zeros((Cu,), jnp.float32).at[:cout].set(b.astype(jnp.float32))
        affs.append(jnp.stack([sc, bs, cb], axis=0))                    # (3, Cu)
        wp = jnp.zeros((3, 3, Cu, Cu), jnp.float32).at[:, :, :cin, :cout].set(
            w.astype(jnp.float32))
        # (Cu, 9*Cu): rows = cout, cols ordered (kh, kw) outer, cin inner
        wms.append(jnp.transpose(wp, (3, 0, 1, 2)).reshape(Cu, 9 * Cu))
    aff = jnp.stack(affs, axis=0)[..., None]    # (4, 3, Cu, 1)
    wslab = jnp.stack(wms, axis=0)              # (4, Cu, 9*Cu)
    return aff, wslab


# --------------------------------------------------------------------------
# Fused Pallas kernel: whole AttentionModule forward (batch folded into lanes)
# --------------------------------------------------------------------------
def _fused_attention_kernel(W, Wp,
                            x_ref, mk_ref, apool_ref, ares_ref,
                            tmhi_ref, tmlo_ref, aff_ref, w_ref, o_ref):
    C, lanes_hi = x_ref.shape
    lanes_lo = apool_ref.shape[1]

    x = x_ref[...]                                            # (C, N*HW)
    mk = jnp.broadcast_to(mk_ref[...], (C, lanes_hi))         # hoisted broadcast
    aff = aff_ref[...]                                        # (4, 3, C, 1)
    wts = w_ref[...]                                          # (4, C, 9C)
    tm_hi = tmhi_ref[...]                                     # (9C, lanes_hi)
    tm_lo = tmlo_ref[...]                                     # (9C, lanes_lo)

    def mish(y):
        # Mish(y) = y * tanh(softplus(y)); exp(-2*softplus(y)) = where(y>=0,t^2,1)/(1+t)^2
        t = jnp.exp(-jnp.abs(y))
        opt = 1.0 + t
        e2sp = jnp.where(y >= 0.0, t * t, 1.0) * pl.reciprocal(
            opt * opt, approx=_APPROX_RECIP)
        return y * (1.0 - e2sp) * pl.reciprocal(1.0 + e2sp, approx=_APPROX_RECIP)

    def mask_block(a, blk, tap_mask, w_sz, lanes):
        """BN(eval) -> Mish -> Conv2d 3x3 pad=1 on channel-major (C, lanes) data."""
        act = mish(a * aff[blk, 0] + aff[blk, 1])             # (C, lanes)
        pieces = []
        for dh in (-1, 0, 1):
            for dw in (-1, 0, 1):
                s = dh * w_sz + dw                            # tap offset in lanes
                pieces.append(act if s == 0 else
                              pltpu.roll(act, shift=(-s) % lanes, axis=1))
        # im2col-in-registers: (9C, lanes), wrap killed by the tap mask
        patches = jnp.concatenate(pieces, axis=0) * tap_mask
        out = jnp.dot(wts[blk], patches, preferred_element_type=jnp.float32)
        return out + aff[blk, 2]

    xm = x * mk

    # ---- trunk branch ----
    t = mask_block(xm, 0, tm_hi, W, lanes_hi) * mk
    t = mask_block(t, 1, tm_hi, W, lanes_hi) * mk

    # ---- mask branch ----
    m = jnp.dot(xm, apool_ref[...], preferred_element_type=jnp.float32)   # avg-pool
    m = mask_block(m, 2, tm_lo, Wp, lanes_lo)
    m = mask_block(m, 3, tm_lo, Wp, lanes_lo)
    m = jnp.dot(m, ares_ref[...], preferred_element_type=jnp.float32)     # upsample+resize
    m = m * mk

    # ---- channel softmax + combine: out = (1 + softmax_C(m)) * trunk ----
    z = m - jnp.max(m, axis=0, keepdims=True)
    e = jnp.exp(z)
    denom = jnp.sum(e, axis=0, keepdims=True)
    sm = e * pl.reciprocal(denom, approx=_APPROX_RECIP)
    o_ref[...] = ((1.0 + sm) * t).astype(o_ref.dtype)


# --------------------------------------------------------------------------
# Wrapper: single pallas_call, single grid step, batch folded into lanes
# --------------------------------------------------------------------------
@jax.jit
def attention_module_forward(x_nchw, mask_nchw, params):
    N, Cin, H, W = x_nchw.shape
    Cout = params["trunk"][0][3].shape[0]
    Cu = max(Cout, ((Cin + 7) // 8) * 8)        # sublane-aligned channel count
    # TODO(synk): masked channel softmax for Cout < Cu (padded output channels)
    # is not implemented; the module's geometry here has Cout == Cu == 8.
    assert Cout == Cu, "dim_out must equal the padded channel count"

    HW = H * W
    lanes_hi = N * HW
    A_pool_bd, A_res_bd, tm_hi, tm_lo, Hp, Wp = _build_constants(N, H, W, Cu)
    aff, wslab = _pack_params(params, Cu)

    f32 = jnp.float32
    # NCHW -> channel-major with the batch folded into lanes: (Cu, N*H*W)
    xp = jnp.pad(x_nchw.astype(f32), ((0, 0), (0, Cu - Cin), (0, 0), (0, 0)))
    x = jnp.transpose(xp.reshape(N, Cu, HW), (1, 0, 2)).reshape(Cu, lanes_hi)
    mk = jnp.transpose(mask_nchw.astype(f32).reshape(N, 1, HW),
                       (1, 0, 2)).reshape(1, lanes_hi)

    kernel = functools.partial(_fused_attention_kernel, W, Wp)

    def full_spec(arr):
        nd = arr.ndim
        return pl.BlockSpec(arr.shape, lambda i, nd=nd: (0,) * nd)

    operands = (x, mk, A_pool_bd, A_res_bd, tm_hi, tm_lo, aff, wslab)

    out = pl.pallas_call(
        kernel,
        out_shape=jax.ShapeDtypeStruct((Cu, lanes_hi), x_nchw.dtype),
        grid=(1,),
        in_specs=[full_spec(a) for a in operands],
        out_specs=pl.BlockSpec((Cu, lanes_hi), lambda i: (0, 0)),
        compiler_params=pltpu.CompilerParams(dimension_semantics=("arbitrary",)),
    )(*operands)

    out = jnp.transpose(out.reshape(Cu, N, H, W), (1, 0, 2, 3))
    return out[:, :Cout]


# --------------------------------------------------------------------------
# Deterministic parameter construction (PyTorch-style init, BN eval-folded)
# --------------------------------------------------------------------------
def make_maskblock_params(key, cin, cout):
    k1, k2, k3, k4, k5, k6 = jax.random.split(key, 6)
    gamma = 1.0 + 0.1 * jax.random.normal(k1, (cin,))
    beta = 0.1 * jax.random.normal(k2, (cin,))
    rmean = 0.1 * jax.random.normal(k3, (cin,))
    rvar = 0.9 + 0.1 * jnp.abs(jax.random.normal(k4, (cin,)))
    eps = 1e-5
    scale = gamma / jnp.sqrt(rvar + eps)
    bias = beta - rmean * scale
    bound = 1.0 / float((cin * 9) ** 0.5)       # PyTorch Conv2d default init
    # weight indexed (kh, kw, cin, cout): W_pytorch[co, ci, kh, kw] == w[kh, kw, ci, co]
    w = jax.random.uniform(k5, (3, 3, cin, cout), minval=-bound, maxval=bound)
    b = jax.random.uniform(k6, (cout,), minval=-bound, maxval=bound)
    return (scale.astype(jnp.float32), bias.astype(jnp.float32),
            w.astype(jnp.float32), b.astype(jnp.float32))


if __name__ == "__main__":
    N, DIM, DIM_OUT, H, W = 2, 4, 8, 16, 16

    key = jax.random.PRNGKey(0)
    kx, km, k0, k1, k2, k3 = jax.random.split(key, 6)

    x = jax.random.normal(kx, (N, DIM, H, W), jnp.float32)            # NCHW input
    mask = jax.nn.sigmoid(jax.random.normal(km, (N, 1, H, W), jnp.float32))

    params = {
        "trunk": [make_maskblock_params(k0, DIM, DIM_OUT),
                  make_maskblock_params(k1, DIM_OUT, DIM_OUT)],
        "mask":  [make_maskblock_params(k2, DIM, DIM_OUT),
                  make_maskblock_params(k3, DIM_OUT, DIM_OUT)],
    }

    out = attention_module_forward(x, mask, params)
    out = jax.block_until_ready(out)
    assert out.shape == (N, DIM_OUT, H, W)
    assert bool(jnp.all(jnp.isfinite(out)))
    print("KERNEL_OK")
</pallas_src>

<mosaic_0001>
module attributes {stable_mosaic.version = 11 : i64} {
  func.func @_fused_attention_kernel(%arg0: i32, %arg1: memref<8x512xf32, #tpu.memory_space<vmem>>, %arg2: memref<1x512xf32, #tpu.memory_space<vmem>>, %arg3: memref<512x128xf32, #tpu.memory_space<vmem>>, %arg4: memref<128x512xf32, #tpu.memory_space<vmem>>, %arg5: memref<72x512xf32, #tpu.memory_space<vmem>>, %arg6: memref<72x128xf32, #tpu.memory_space<vmem>>, %arg7: memref<4x3x8x1xf32, #tpu.memory_space<vmem>>, %arg8: memref<4x8x72xf32, #tpu.memory_space<vmem>>, %arg9: memref<8x512xf32, #tpu.memory_space<vmem>>) attributes {dimension_semantics = [#tpu.dimension_semantics<arbitrary>], iteration_bounds = array<i64: 1>, scalar_prefetch = 0 : i64, scratch_operands = 0 : i64, tpu.core_type = #tpu.core_type<tc>, window_params = [{pipeline_mode = #tpu.pipeline_mode<synchronous>, transform_indices = @transform_0, window_bounds = array<i64: 8, 512>}, {pipeline_mode = #tpu.pipeline_mode<synchronous>, transform_indices = @transform_1, window_bounds = array<i64: 1, 512>}, {pipeline_mode = #tpu.pipeline_mode<synchronous>, transform_indices = @transform_2, window_bounds = array<i64: 512, 128>}, {pipeline_mode = #tpu.pipeline_mode<synchronous>, transform_indices = @transform_3, window_bounds = array<i64: 128, 512>}, {pipeline_mode = #tpu.pipeline_mode<synchronous>, transform_indices = @transform_4, window_bounds = array<i64: 72, 512>}, {pipeline_mode = #tpu.pipeline_mode<synchronous>, transform_indices = @transform_5, window_bounds = array<i64: 72, 128>}, {pipeline_mode = #tpu.pipeline_mode<synchronous>, transform_indices = @transform_6, window_bounds = array<i64: 4, 3, 8, 1>}, {pipeline_mode = #tpu.pipeline_mode<synchronous>, transform_indices = @transform_7, window_bounds = array<i64: 4, 8, 72>}, {pipeline_mode = #tpu.pipeline_mode<synchronous>, transform_indices = @transform_8, window_bounds = array<i64: 8, 512>}]} {
    %c0 = arith.constant 0 : index
    %c0_0 = arith.constant 0 : index
    %0 = vector.load %arg1[%c0, %c0_0] : memref<8x512xf32, #tpu.memory_space<vmem>>, vector<8x512xf32>
    %c0_1 = arith.constant 0 : index
    %c0_2 = arith.constant 0 : index
    %1 = vector.load %arg2[%c0_1, %c0_2] : memref<1x512xf32, #tpu.memory_space<vmem>>, vector<1x512xf32>
    %2 = vector.shape_cast %1 : vector<1x512xf32> to vector<1x512xf32>
    %3 = vector.broadcast %2 : vector<1x512xf32> to vector<8x512xf32>
    %c0_3 = arith.constant 0 : index
    %c0_4 = arith.constant 0 : index
    %c0_5 = arith.constant 0 : index
    %c0_6 = arith.constant 0 : index
    %4 = vector.load %arg7[%c0_3, %c0_4, %c0_5, %c0_6] : memref<4x3x8x1xf32, #tpu.memory_space<vmem>>, vector<4x3x8x1xf32>
    %c0_7 = arith.constant 0 : index
    %c0_8 = arith.constant 0 : index
    %c0_9 = arith.constant 0 : index
    %5 = vector.load %arg8[%c0_7, %c0_8, %c0_9] : memref<4x8x72xf32, #tpu.memory_space<vmem>>, vector<4x8x72xf32>
    %c0_10 = arith.constant 0 : index
    %c0_11 = arith.constant 0 : index
    %6 = vector.load %arg5[%c0_10, %c0_11] : memref<72x512xf32, #tpu.memory_space<vmem>>, vector<72x512xf32>
    %c0_12 = arith.constant 0 : index
    %c0_13 = arith.constant 0 : index
    %7 = vector.load %arg6[%c0_12, %c0_13] : memref<72x128xf32, #tpu.memory_space<vmem>>, vector<72x128xf32>
    %8 = arith.mulf %0, %3 : vector<8x512xf32>
    %9 = vector.extract_strided_slice %4 {offsets = [0, 0, 0, 0], sizes = [1, 1, 8, 1], strides = [1, 1, 1, 1]} : vector<4x3x8x1xf32> to vector<1x1x8x1xf32>
    %10 = vector.shape_cast %9 : vector<1x1x8x1xf32> to vector<8x1xf32>
    %11 = vector.broadcast %10 : vector<8x1xf32> to vector<8x512xf32>
    %12 = arith.mulf %8, %11 : vector<8x512xf32>
    %13 = vector.extract_strided_slice %4 {offsets = [0, 1, 0, 0], sizes = [1, 1, 8, 1], strides = [1, 1, 1, 1]} : vector<4x3x8x1xf32> to vector<1x1x8x1xf32>
    %14 = vector.shape_cast %13 : vector<1x1x8x1xf32> to vector<8x1xf32>
    %15 = vector.broadcast %14 : vector<8x1xf32> to vector<8x512xf32>
    %16 = arith.addf %12, %15 : vector<8x512xf32>
    %17 = math.absf %16 : vector<8x512xf32>
    %cst = arith.constant 0.000000e+00 : f32
    %18 = vector.broadcast %cst : f32 to vector<8x512xf32>
    %19 = arith.subf %18, %17 : vector<8x512xf32>
    %20 = math.exp %19 : vector<8x512xf32>
    %cst_14 = arith.constant 1.000000e+00 : f32
    %21 = vector.broadcast %cst_14 : f32 to vector<8x512xf32>
    %22 = arith.addf %21, %20 : vector<8x512xf32>
    %cst_15 = arith.constant 0.000000e+00 : f32
    %23 = vector.broadcast %cst_15 : f32 to vector<8x512xf32>
    %24 = arith.cmpf oge, %16, %23 : vector<8x512xf32>
    %25 = arith.mulf %20, %20 : vector<8x512xf32>
    %cst_16 = arith.constant 1.000000e+00 : f32
    %26 = vector.broadcast %cst_16 : f32 to vector<8x512xf32>
    %27 = arith.select %24, %25, %26 : vector<8x512xi1>, vector<8x512xf32>
    %28 = arith.mulf %22, %22 : vector<8x512xf32>
    %29 = tpu.reciprocal %28 {approx = true} : vector<8x512xf32> -> vector<8x512xf32>
    %30 = arith.mulf %27, %29 : vector<8x512xf32>
    %cst_17 = arith.constant 1.000000e+00 : f32
    %31 = vector.broadcast %cst_17 : f32 to vector<8x512xf32>
    %32 = arith.subf %31, %30 : vector<8x512xf32>
    %33 = arith.mulf %16, %32 : vector<8x512xf32>
    %cst_18 = arith.constant 1.000000e+00 : f32
    %34 = vector.broadcast %cst_18 : f32 to vector<8x512xf32>
    %35 = arith.addf %34, %30 : vector<8x512xf32>
    %36 = tpu.reciprocal %35 {approx = true} : vector<8x512xf32> -> vector<8x512xf32>
    %37 = arith.mulf %33, %36 : vector<8x512xf32>
    %c17_i32 = arith.constant 17 : i32
    %38 = tpu.dynamic_rotate %37 by %c17_i32 dim 1 : vector<8x512xf32>, i32 -> vector<8x512xf32>
    %c16_i32 = arith.constant 16 : i32
    %39 = tpu.dynamic_rotate %37 by %c16_i32 dim 1 : vector<8x512xf32>, i32 -> vector<8x512xf32>
    %c15_i32 = arith.constant 15 : i32
    %40 = tpu.dynamic_rotate %37 by %c15_i32 dim 1 : vector<8x512xf32>, i32 -> vector<8x512xf32>
    %c1_i32 = arith.constant 1 : i32
    %41 = tpu.dynamic_rotate %37 by %c1_i32 dim 1 : vector<8x512xf32>, i32 -> vector<8x512xf32>
    %c511_i32 = arith.constant 511 : i32
    %42 = tpu.dynamic_rotate %37 by %c511_i32 dim 1 : vector<8x512xf32>, i32 -> vector<8x512xf32>
    %c497_i32 = arith.constant 497 : i32
    %43 = tpu.dynamic_rotate %37 by %c497_i32 dim 1 : vector<8x512xf32>, i32 -> vector<8x512xf32>
    %c496_i32 = arith.constant 496 : i32
    %44 = tpu.dynamic_rotate %37 by %c496_i32 dim 1 : vector<8x512xf32>, i32 -> vector<8x512xf32>
    %c495_i32 = arith.constant 495 : i32
    %45 = tpu.dynamic_rotate %37 by %c495_i32 dim 1 : vector<8x512xf32>, i32 -> vector<8x512xf32>
    %46 = tpu.concatenate %38, %39, %40, %41, %37, %42, %43, %44, %45 in 0 : vector<8x512xf32>, vector<8x512xf32>, vector<8x512xf32>, vector<8x512xf32>, vector<8x512xf32>, vector<8x512xf32>, vector<8x512xf32>, vector<8x512xf32>, vector<8x512xf32> -> vector<72x512xf32>
    %47 = arith.mulf %46, %6 : vector<72x512xf32>
    %48 = vector.extract_strided_slice %5 {offsets = [0, 0, 0], sizes = [1, 8, 72], strides = [1, 1, 1]} : vector<4x8x72xf32> to vector<1x8x72xf32>
    %49 = vector.shape_cast %48 : vector<1x8x72xf32> to vector<8x72xf32>
    %cst_19 = arith.constant dense<0.000000e+00> : vector<8x512xf32>
    %50 = tpu.matmul %49, %47, %cst_19 {dimension_numbers = #tpu.dot_dimension_numbers<[1], [0], [0], [1], [0, 0, 1, 1], [], []>} : vector<8x72xf32>, vector<72x512xf32>, vector<8x512xf32> -> vector<8x512xf32>
    %51 = vector.extract_strided_slice %4 {offsets = [0, 2, 0, 0], sizes = [1, 1, 8, 1], strides = [1, 1, 1, 1]} : vector<4x3x8x1xf32> to vector<1x1x8x1xf32>
    %52 = vector.shape_cast %51 : vector<1x1x8x1xf32> to vector<8x1xf32>
    %53 = vector.broadcast %52 : vector<8x1xf32> to vector<8x512xf32>
    %54 = arith.addf %50, %53 : vector<8x512xf32>
    %55 = arith.mulf %54, %3 : vector<8x512xf32>
    %56 = vector.extract_strided_slice %4 {offsets = [1, 0, 0, 0], sizes = [1, 1, 8, 1], strides = [1, 1, 1, 1]} : vector<4x3x8x1xf32> to vector<1x1x8x1xf32>
    %57 = vector.shape_cast %56 : vector<1x1x8x1xf32> to vector<8x1xf32>
    %58 = vector.broadcast %57 : vector<8x1xf32> to vector<8x512xf32>
    %59 = arith.mulf %55, %58 : vector<8x512xf32>
    %60 = vector.extract_strided_slice %4 {offsets = [1, 1, 0, 0], sizes = [1, 1, 8, 1], strides = [1, 1, 1, 1]} : vector<4x3x8x1xf32> to vector<1x1x8x1xf32>
    %61 = vector.shape_cast %60 : vector<1x1x8x1xf32> to vector<8x1xf32>
    %62 = vector.broadcast %61 : vector<8x1xf32> to vector<8x512xf32>
    %63 = arith.addf %59, %62 : vector<8x512xf32>
    %64 = math.absf %63 : vector<8x512xf32>
    %cst_20 = arith.constant 0.000000e+00 : f32
    %65 = vector.broadcast %cst_20 : f32 to vector<8x512xf32>
    %66 = arith.subf %65, %64 : vector<8x512xf32>
    %67 = math.exp %66 : vector<8x512xf32>
    %cst_21 = arith.constant 1.000000e+00 : f32
    %68 = vector.broadcast %cst_21 : f32 to vector<8x512xf32>
    %69 = arith.addf %68, %67 : vector<8x512xf32>
    %cst_22 = arith.constant 0.000000e+00 : f32
    %70 = vector.broadcast %cst_22 : f32 to vector<8x512xf32>
    %71 = arith.cmpf oge, %63, %70 : vector<8x512xf32>
    %72 = arith.mulf %67, %67 : vector<8x512xf32>
    %cst_23 = arith.constant 1.000000e+00 : f32
    %73 = vector.broadcast %cst_23 : f32 to vector<8x512xf32>
    %74 = arith.select %71, %72, %73 : vector<8x512xi1>, vector<8x512xf32>
    %75 = arith.mulf %69, %69 : vector<8x512xf32>
    %76 = tpu.reciprocal %75 {approx = true} : vector<8x512xf32> -> vector<8x512xf32>
    %77 = arith.mulf %74, %76 : vector<8x512xf32>
    %cst_24 = arith.constant 1.000000e+00 : f32
    %78 = vector.broadcast %cst_24 : f32 to vector<8x512xf32>
    %79 = arith.subf %78, %77 : vector<8x512xf32>
    %80 = arith.mulf %63, %79 : vector<8x512xf32>
    %cst_25 = arith.constant 1.000000e+00 : f32
    %81 = vector.broadcast %cst_25 : f32 to vector<8x512xf32>
    %82 = arith.addf %81, %77 : vector<8x512xf32>
    %83 = tpu.reciprocal %82 {approx = true} : vector<8x512xf32> -> vector<8x512xf32>
    %84 = arith.mulf %80, %83 : vector<8x512xf32>
    %c17_i32_26 = arith.constant 17 : i32
    %85 = tpu.dynamic_rotate %84 by %c17_i32_26 dim 1 : vector<8x512xf32>, i32 -> vector<8x512xf32>
    %c16_i32_27 = arith.constant 16 : i32
    %86 = tpu.dynamic_rotate %84 by %c16_i32_27 dim 1 : vector<8x512xf32>, i32 -> vector<8x512xf32>
    %c15_i32_28 = arith.constant 15 : i32
    %87 = tpu.dynamic_rotate %84 by %c15_i32_28 dim 1 : vector<8x512xf32>, i32 -> vector<8x512xf32>
    %c1_i32_29 = arith.constant 1 : i32
    %88 = tpu.dynamic_rotate %84 by %c1_i32_29 dim 1 : vector<8x512xf32>, i32 -> vector<8x512xf32>
    %c511_i32_30 = arith.constant 511 : i32
    %89 = tpu.dynamic_rotate %84 by %c511_i32_30 dim 1 : vector<8x512xf32>, i32 -> vector<8x512xf32>
    %c497_i32_31 = arith.constant 497 : i32
    %90 = tpu.dynamic_rotate %84 by %c497_i32_31 dim 1 : vector<8x512xf32>, i32 -> vector<8x512xf32>
    %c496_i32_32 = arith.constant 496 : i32
    %91 = tpu.dynamic_rotate %84 by %c496_i32_32 dim 1 : vector<8x512xf32>, i32 -> vector<8x512xf32>
    %c495_i32_33 = arith.constant 495 : i32
    %92 = tpu.dynamic_rotate %84 by %c495_i32_33 dim 1 : vector<8x512xf32>, i32 -> vector<8x512xf32>
    %93 = tpu.concatenate %85, %86, %87, %88, %84, %89, %90, %91, %92 in 0 : vector<8x512xf32>, vector<8x512xf32>, vector<8x512xf32>, vector<8x512xf32>, vector<8x512xf32>, vector<8x512xf32>, vector<8x512xf32>, vector<8x512xf32>, vector<8x512xf32> -> vector<72x512xf32>
    %94 = arith.mulf %93, %6 : vector<72x512xf32>
    %95 = vector.extract_strided_slice %5 {offsets = [1, 0, 0], sizes = [1, 8, 72], strides = [1, 1, 1]} : vector<4x8x72xf32> to vector<1x8x72xf32>
    %96 = vector.shape_cast %95 : vector<1x8x72xf32> to vector<8x72xf32>
    %cst_34 = arith.constant dense<0.000000e+00> : vector<8x512xf32>
    %97 = tpu.matmul %96, %94, %cst_34 {dimension_numbers = #tpu.dot_dimension_numbers<[1], [0], [0], [1], [0, 0, 1, 1], [], []>} : vector<8x72xf32>, vector<72x512xf32>, vector<8x512xf32> -> vector<8x512xf32>
    %98 = vector.extract_strided_slice %4 {offsets = [1, 2, 0, 0], sizes = [1, 1, 8, 1], strides = [1, 1, 1, 1]} : vector<4x3x8x1xf32> to vector<1x1x8x1xf32>
    %99 = vector.shape_cast %98 : vector<1x1x8x1xf32> to vector<8x1xf32>
    %100 = vector.broadcast %99 : vector<8x1xf32> to vector<8x512xf32>
    %101 = arith.addf %97, %100 : vector<8x512xf32>
    %102 = arith.mulf %101, %3 : vector<8x512xf32>
    %c0_35 = arith.constant 0 : index
    %c0_36 = arith.constant 0 : index
    %103 = vector.load %arg3[%c0_35, %c0_36] : memref<512x128xf32, #tpu.memory_space<vmem>>, vector<512x128xf32>
    %cst_37 = arith.constant dense<0.000000e+00> : vector<8x128xf32>
    %104 = tpu.matmul %8, %103, %cst_37 {dimension_numbers = #tpu.dot_dimension_numbers<[1], [0], [0], [1], [0, 0, 1, 1], [], []>} : vector<8x512xf32>, vector<512x128xf32>, vector<8x128xf32> -> vector<8x128xf32>
    %105 = vector.extract_strided_slice %4 {offsets = [2, 0, 0, 0], sizes = [1, 1, 8, 1], strides = [1, 1, 1, 1]} : vector<4x3x8x1xf32> to vector<1x1x8x1xf32>
    %106 = vector.shape_cast %105 : vector<1x1x8x1xf32> to vector<8x1xf32>
    %107 = vector.broadcast %106 : vector<8x1xf32> to vector<8x128xf32>
    %108 = arith.mulf %104, %107 : vector<8x128xf32>
    %109 = vector.extract_strided_slice %4 {offsets = [2, 1, 0, 0], sizes = [1, 1, 8, 1], strides = [1, 1, 1, 1]} : vector<4x3x8x1xf32> to vector<1x1x8x1xf32>
    %110 = vector.shape_cast %109 : vector<1x1x8x1xf32> to vector<8x1xf32>
    %111 = vector.broadcast %110 : vector<8x1xf32> to vector<8x128xf32>
    %112 = arith.addf %108, %111 : vector<8x128xf32>
    %113 = math.absf %112 : vector<8x128xf32>
    %cst_38 = arith.constant 0.000000e+00 : f32
    %114 = vector.broadcast %cst_38 : f32 to vector<8x128xf32>
    %115 = arith.subf %114, %113 : vector<8x128xf32>
    %116 = math.exp %115 : vector<8x128xf32>
    %cst_39 = arith.constant 1.000000e+00 : f32
    %117 = vector.broadcast %cst_39 : f32 to vector<8x128xf32>
    %118 = arith.addf %117, %116 : vector<8x128xf32>
    %cst_40 = arith.constant 0.000000e+00 : f32
    %119 = vector.broadcast %cst_40 : f32 to vector<8x128xf32>
    %120 = arith.cmpf oge, %112, %119 : vector<8x128xf32>
    %121 = arith.mulf %116, %116 : vector<8x128xf32>
    %cst_41 = arith.constant 1.000000e+00 : f32
    %122 = vector.broadcast %cst_41 : f32 to vector<8x128xf32>
    %123 = arith.select %120, %121, %122 : vector<8x128xi1>, vector<8x128xf32>
    %124 = arith.mulf %118, %118 : vector<8x128xf32>
    %125 = tpu.reciprocal %124 {approx = true} : vector<8x128xf32> -> vector<8x128xf32>
    %126 = arith.mulf %123, %125 : vector<8x128xf32>
    %cst_42 = arith.constant 1.000000e+00 : f32
    %127 = vector.broadcast %cst_42 : f32 to vector<8x128xf32>
    %128 = arith.subf %127, %126 : vector<8x128xf32>
    %129 = arith.mulf %112, %128 : vector<8x128xf32>
    %cst_43 = arith.constant 1.000000e+00 : f32
    %130 = vector.broadcast %cst_43 : f32 to vector<8x128xf32>
    %131 = arith.addf %130, %126 : vector<8x128xf32>
    %132 = tpu.reciprocal %131 {approx = true} : vector<8x128xf32> -> vector<8x128xf32>
    %133 = arith.mulf %129, %132 : vector<8x128xf32>
    %c9_i32 = arith.constant 9 : i32
    %134 = tpu.dynamic_rotate %133 by %c9_i32 dim 1 : vector<8x128xf32>, i32 -> vector<8x128xf32>
    %c8_i32 = arith.constant 8 : i32
    %135 = tpu.dynamic_rotate %133 by %c8_i32 dim 1 : vector<8x128xf32>, i32 -> vector<8x128xf32>
    %c7_i32 = arith.constant 7 : i32
    %136 = tpu.dynamic_rotate %133 by %c7_i32 dim 1 : vector<8x128xf32>, i32 -> vector<8x128xf32>
    %c1_i32_44 = arith.constant 1 : i32
    %137 = tpu.dynamic_rotate %133 by %c1_i32_44 dim 1 : vector<8x128xf32>, i32 -> vector<8x128xf32>
    %c127_i32 = arith.constant 127 : i32
    %138 = tpu.dynamic_rotate %133 by %c127_i32 dim 1 : vector<8x128xf32>, i32 -> vector<8x128xf32>
    %c121_i32 = arith.constant 121 : i32
    %139 = tpu.dynamic_rotate %133 by %c121_i32 dim 1 : vector<8x128xf32>, i32 -> vector<8x128xf32>
    %c120_i32 = arith.constant 120 : i32
    %140 = tpu.dynamic_rotate %133 by %c120_i32 dim 1 : vector<8x128xf32>, i32 -> vector<8x128xf32>
    %c119_i32 = arith.constant 119 : i32
    %141 = tpu.dynamic_rotate %133 by %c119_i32 dim 1 : vector<8x128xf32>, i32 -> vector<8x128xf32>
    %142 = tpu.concatenate %134, %135, %136, %137, %133, %138, %139, %140, %141 in 0 : vector<8x128xf32>, vector<8x128xf32>, vector<8x128xf32>, vector<8x128xf32>, vector<8x128xf32>, vector<8x128xf32>, vector<8x128xf32>, vector<8x128xf32>, vector<8x128xf32> -> vector<72x128xf32>
    %143 = arith.mulf %142, %7 : vector<72x128xf32>
    %144 = vector.extract_strided_slice %5 {offsets = [2, 0, 0], sizes = [1, 8, 72], strides = [1, 1, 1]} : vector<4x8x72xf32> to vector<1x8x72xf32>
    %145 = vector.shape_cast %144 : vector<1x8x72xf32> to vector<8x72xf32>
    %cst_45 = arith.constant dense<0.000000e+00> : vector<8x128xf32>
    %146 = tpu.matmul %145, %143, %cst_45 {dimension_numbers = #tpu.dot_dimension_numbers<[1], [0], [0], [1], [0, 0, 1, 1], [], []>} : vector<8x72xf32>, vector<72x128xf32>, vector<8x128xf32> -> vector<8x128xf32>
    %147 = vector.extract_strided_slice %4 {offsets = [2, 2, 0, 0], sizes = [1, 1, 8, 1], strides = [1, 1, 1, 1]} : vector<4x3x8x1xf32> to vector<1x1x8x1xf32>
    %148 = vector.shape_cast %147 : vector<1x1x8x1xf32> to vector<8x1xf32>
    %149 = vector.broadcast %148 : vector<8x1xf32> to vector<8x128xf32>
    %150 = arith.addf %146, %149 : vector<8x128xf32>
    %151 = vector.extract_strided_slice %4 {offsets = [3, 0, 0, 0], sizes = [1, 1, 8, 1], strides = [1, 1, 1, 1]} : vector<4x3x8x1xf32> to vector<1x1x8x1xf32>
    %152 = vector.shape_cast %151 : vector<1x1x8x1xf32> to vector<8x1xf32>
    %153 = vector.broadcast %152 : vector<8x1xf32> to vector<8x128xf32>
    %154 = arith.mulf %150, %153 : vector<8x128xf32>
    %155 = vector.extract_strided_slice %4 {offsets = [3, 1, 0, 0], sizes = [1, 1, 8, 1], strides = [1, 1, 1, 1]} : vector<4x3x8x1xf32> to vector<1x1x8x1xf32>
    %156 = vector.shape_cast %155 : vector<1x1x8x1xf32> to vector<8x1xf32>
    %157 = vector.broadcast %156 : vector<8x1xf32> to vector<8x128xf32>
    %158 = arith.addf %154, %157 : vector<8x128xf32>
    %159 = math.absf %158 : vector<8x128xf32>
    %cst_46 = arith.constant 0.000000e+00 : f32
    %160 = vector.broadcast %cst_46 : f32 to vector<8x128xf32>
    %161 = arith.subf %160, %159 : vector<8x128xf32>
    %162 = math.exp %161 : vector<8x128xf32>
    %cst_47 = arith.constant 1.000000e+00 : f32
    %163 = vector.broadcast %cst_47 : f32 to vector<8x128xf32>
    %164 = arith.addf %163, %162 : vector<8x128xf32>
    %cst_48 = arith.constant 0.000000e+00 : f32
    %165 = vector.broadcast %cst_48 : f32 to vector<8x128xf32>
    %166 = arith.cmpf oge, %158, %165 : vector<8x128xf32>
    %167 = arith.mulf %162, %162 : vector<8x128xf32>
    %cst_49 = arith.constant 1.000000e+00 : f32
    %168 = vector.broadcast %cst_49 : f32 to vector<8x128xf32>
    %169 = arith.select %166, %167, %168 : vector<8x128xi1>, vector<8x128xf32>
    %170 = arith.mulf %164, %164 : vector<8x128xf32>
    %171 = tpu.reciprocal %170 {approx = true} : vector<8x128xf32> -> vector<8x128xf32>
    %172 = arith.mulf %169, %171 : vector<8x128xf32>
    %cst_50 = arith.constant 1.000000e+00 : f32
    %173 = vector.broadcast %cst_50 : f32 to vector<8x128xf32>
    %174 = arith.subf %173, %172 : vector<8x128xf32>
    %175 = arith.mulf %158, %174 : vector<8x128xf32>
    %cst_51 = arith.constant 1.000000e+00 : f32
    %176 = vector.broadcast %cst_51 : f32 to vector<8x128xf32>
    %177 = arith.addf %176, %172 : vector<8x128xf32>
    %178 = tpu.reciprocal %177 {approx = true} : vector<8x128xf32> -> vector<8x128xf32>
    %179 = arith.mulf %175, %178 : vector<8x128xf32>
    %c9_i32_52 = arith.constant 9 : i32
    %180 = tpu.dynamic_rotate %179 by %c9_i32_52 dim 1 : vector<8x128xf32>, i32 -> vector<8x128xf32>
    %c8_i32_53 = arith.constant 8 : i32
    %181 = tpu.dynamic_rotate %179 by %c8_i32_53 dim 1 : vector<8x128xf32>, i32 -> vector<8x128xf32>
    %c7_i32_54 = arith.constant 7 : i32
    %182 = tpu.dynamic_rotate %179 by %c7_i32_54 dim 1 : vector<8x128xf32>, i32 -> vector<8x128xf32>
    %c1_i32_55 = arith.constant 1 : i32
    %183 = tpu.dynamic_rotate %179 by %c1_i32_55 dim 1 : vector<8x128xf32>, i32 -> vector<8x128xf32>
    %c127_i32_56 = arith.constant 127 : i32
    %184 = tpu.dynamic_rotate %179 by %c127_i32_56 dim 1 : vector<8x128xf32>, i32 -> vector<8x128xf32>
    %c121_i32_57 = arith.constant 121 : i32
    %185 = tpu.dynamic_rotate %179 by %c121_i32_57 dim 1 : vector<8x128xf32>, i32 -> vector<8x128xf32>
    %c120_i32_58 = arith.constant 120 : i32
    %186 = tpu.dynamic_rotate %179 by %c120_i32_58 dim 1 : vector<8x128xf32>, i32 -> vector<8x128xf32>
    %c119_i32_59 = arith.constant 119 : i32
    %187 = tpu.dynamic_rotate %179 by %c119_i32_59 dim 1 : vector<8x128xf32>, i32 -> vector<8x128xf32>
    %188 = tpu.concatenate %180, %181, %182, %183, %179, %184, %185, %186, %187 in 0 : vector<8x128xf32>, vector<8x128xf32>, vector<8x128xf32>, vector<8x128xf32>, vector<8x128xf32>, vector<8x128xf32>, vector<8x128xf32>, vector<8x128xf32>, vector<8x128xf32> -> vector<72x128xf32>
    %189 = arith.mulf %188, %7 : vector<72x128xf32>
    %190 = vector.extract_strided_slice %5 {offsets = [3, 0, 0], sizes = [1, 8, 72], strides = [1, 1, 1]} : vector<4x8x72xf32> to vector<1x8x72xf32>
    %191 = vector.shape_cast %190 : vector<1x8x72xf32> to vector<8x72xf32>
    %cst_60 = arith.constant dense<0.000000e+00> : vector<8x128xf32>
    %192 = tpu.matmul %191, %189, %cst_60 {dimension_numbers = #tpu.dot_dimension_numbers<[1], [0], [0], [1], [0, 0, 1, 1], [], []>} : vector<8x72xf32>, vector<72x128xf32>, vector<8x128xf32> -> vector<8x128xf32>
    %193 = vector.extract_strided_slice %4 {offsets = [3, 2, 0, 0], sizes = [1, 1, 8, 1], strides = [1, 1, 1, 1]} : vector<4x3x8x1xf32> to vector<1x1x8x1xf32>
    %194 = vector.shape_cast %193 : vector<1x1x8x1xf32> to vector<8x1xf32>
    %195 = vector.broadcast %194 : vector<8x1xf32> to vector<8x128xf32>
    %196 = arith.addf %192, %195 : vector<8x128xf32>
    %c0_61 = arith.constant 0 : index
    %c0_62 = arith.constant 0 : index
    %197 = vector.load %arg4[%c0_61, %c0_62] : memref<128x512xf32, #tpu.memory_space<vmem>>, vector<128x512xf32>
    %cst_63 = arith.constant dense<0.000000e+00> : vector<8x512xf32>
    %198 = tpu.matmul %196, %197, %cst_63 {dimension_numbers = #tpu.dot_dimension_numbers<[1], [0], [0], [1], [0, 0, 1, 1], [], []>} : vector<8x128xf32>, vector<128x512xf32>, vector<8x512xf32> -> vector<8x512xf32>
    %199 = arith.mulf %198, %3 : vector<8x512xf32>
    %cst_64 = arith.constant dense<0xFF800000> : vector<512xf32>
    %200 = vector.multi_reduction <maximumf>, %199, %cst_64 [0] : vector<8x512xf32> to vector<512xf32>
    %201 = vector.shape_cast %200 : vector<512xf32> to vector<1x512xf32>
    %202 = vector.broadcast %201 : vector<1x512xf32> to vector<8x512xf32>
    %203 = arith.subf %199, %202 : vector<8x512xf32>
    %204 = math.exp %203 : vector<8x512xf32>
    %cst_65 = arith.constant dense<0.000000e+00> : vector<512xf32>
    %205 = vector.multi_reduction <add>, %204, %cst_65 [0] : vector<8x512xf32> to vector<512xf32>
    %206 = vector.shape_cast %205 : vector<512xf32> to vector<1x512xf32>
    %207 = tpu.reciprocal %206 {approx = true} : vector<1x512xf32> -> vector<1x512xf32>
    %208 = vector.broadcast %207 : vector<1x512xf32> to vector<8x512xf32>
    %209 = arith.mulf %204, %208 : vector<8x512xf32>
    %cst_66 = arith.constant 1.000000e+00 : f32
    %210 = vector.broadcast %cst_66 : f32 to vector<8x512xf32>
    %211 = arith.addf %210, %209 : vector<8x512xf32>
    %212 = arith.mulf %211, %102 : vector<8x512xf32>
    %c0_67 = arith.constant 0 : index
    %c0_68 = arith.constant 0 : index
    %213 = vector.load %arg9[%c0_67, %c0_68] : memref<8x512xf32, #tpu.memory_space<vmem>>, vector<8x512xf32>
    tpu.vector_store %arg9[%c0_67, %c0_68], %212 {strides = array<i32>} : memref<8x512xf32, #tpu.memory_space<vmem>>, vector<8x512xf32>,
    return
  }
  func.func @transform_0(%arg0: i32) -> (i32, i32) {
    %c0_i32 = arith.constant 0 : i32
    %c0_i32_0 = arith.constant 0 : i32
    %c0_i32_1 = arith.constant 0 : i32
    return %c0_i32, %c0_i32_0 : i32, i32
  }
  func.func @transform_1(%arg0: i32) -> (i32, i32) {
    %c0_i32 = arith.constant 0 : i32
    %c0_i32_0 = arith.constant 0 : i32
    %c0_i32_1 = arith.constant 0 : i32
    return %c0_i32, %c0_i32_0 : i32, i32
  }
  func.func @transform_2(%arg0: i32) -> (i32, i32) {
    %c0_i32 = arith.constant 0 : i32
    %c0_i32_0 = arith.constant 0 : i32
    %c0_i32_1 = arith.constant 0 : i32
    return %c0_i32, %c0_i32_0 : i32, i32
  }
  func.func @transform_3(%arg0: i32) -> (i32, i32) {
    %c0_i32 = arith.constant 0 : i32
    %c0_i32_0 = arith.constant 0 : i32
    %c0_i32_1 = arith.constant 0 : i32
    return %c0_i32, %c0_i32_0 : i32, i32
  }
  func.func @transform_4(%arg0: i32) -> (i32, i32) {
    %c0_i32 = arith.constant 0 : i32
    %c0_i32_0 = arith.constant 0 : i32
    %c0_i32_1 = arith.constant 0 : i32
    return %c0_i32, %c0_i32_0 : i32, i32
  }
  func.func @transform_5(%arg0: i32) -> (i32, i32) {
    %c0_i32 = arith.constant 0 : i32
    %c0_i32_0 = arith.constant 0 : i32
    %c0_i32_1 = arith.constant 0 : i32
    return %c0_i32, %c0_i32_0 : i32, i32
  }
  func.func @transform_6(%arg0: i32) -> (i32, i32, i32, i32) {
    %c0_i32 = arith.constant 0 : i32
    %c0_i32_0 = arith.constant 0 : i32
    %c0_i32_1 = arith.constant 0 : i32
    %c0_i32_2 = arith.constant 0 : i32
    %c0_i32_3 = arith.constant 0 : i32
    return %c0_i32, %c0_i32_0, %c0_i32_1, %c0_i32_2 : i32, i32, i32, i32
  }
  func.func @transform_7(%arg0: i32) -> (i32, i32, i32) {
    %c0_i32 = arith.constant 0 : i32
    %c0_i32_0 = arith.constant 0 : i32
    %c0_i32_1 = arith.constant 0 : i32
    %c0_i32_2 = arith.constant 0 : i32
    return %c0_i32, %c0_i32_0, %c0_i32_1 : i32, i32, i32
  }
  func.func @transform_8(%arg0: i32) -> (i32, i32) {
    %c0_i32 = arith.constant 0 : i32
    %c0_i32_0 = arith.constant 0 : i32
    %c0_i32_1 = arith.constant 0 : i32
    return %c0_i32, %c0_i32_0 : i32, i32
  }
}

</mosaic_0001>

<bundles_post_ra>
// kernel: attention_module_forward.1
= control target key start
LH: loop header
LB: loop body
LE: loop exit
PB: predicated region body
PF: predicated region fallthrough
CT: control target
= control target key end

     0   :  { %13 = vsyncpa [#allocation3], 0  ;;  %s1418_s30 = smov [#allocation2]   ;;  %s1419_s10 = smov 128   ;;  %s2535_s0 = inlined_call_operand.vmem [shape: f32[8,512], index: 0, kind: input, shape index: {}]   ;;  %s2536_s1 = inlined_call_operand.vmem [shape: f32[1,512], index: 1, kind: input, shape index: {}]   ;;  %s2537_s2 = inlined_call_operand.hbm [shape: f32[512,128], index: 2, kind: input, shape index: {}]   ;;  %s2538_s3 = inlined_call_operand.vmem [shape: f32[128,512], index: 3, kind: input, shape index: {}]   ;;  %s2539_s4 = inlined_call_operand.vmem [shape: f32[72,512], index: 4, kind: input, shape index: {}]   ;;  %s2540_s5 = inlined_call_operand.vmem [shape: f32[72,128], index: 5, kind: input, shape index: {}]   ;;  %s2541_s6 = inlined_call_operand.vmem [shape: f32[4,3,8,1], index: 6, kind: input, shape index: {}]   ;;  %s2542_s7 = inlined_call_operand.vmem [shape: f32[4,8,72], index: 7, kind: input, shape index: {}]   ;;  %s2543_s8 = inlined_call_operand.vmem [shape: f32[8,512], index: 8, kind: output, shape index: {}]  }
   0x1   :  { %s22_s29 = sshll.u32 %s2537_s2, 4  ;;  %s24_s9 = sshll.u32 %s1418_s30, 4  ;;  %s23_s29 = int_to_ptr.hbm [resolvable:$true] %s22_s29  ;;  %s25_s9 = int_to_ptr.vmem [resolvable:$true] %s24_s9 }
   0x2   :  { %s1420_s11 = smov 8  }
   0x3   :  { %30 = dma.hbm_to_vmem [thread:$0]  %s23_s29, 8192, %s25_s9, [#allocation3], %s1419_s10, %s1419_s10, %s1420_s11  }
   0x4   :  { %1416 = dma.done.wait [#allocation3], 8192  }
   0x5   :  { %1417 = vsyncadd [#allocation3], 4294959104  ;;  %v1421_v0 = vmov 0   ;;  %v59_v1 = vld [vmem:[%s2541_s6] sm:$0xff]  ;;  %v60_v2 = vld [vmem:[%s2541_s6 + $0x8] sm:$0xff]  ;;  %s1423_s24 = smov 112  }
   0x6   :  { %1313 = vset.pattern.permute.xlu0 %v1421_v0  ;;  %1314 = vset.pattern.permute.xlu1 %v1421_v0  ;;  %v49_v3 = vld [vmem:[%s2536_s1] sm:$0xf]  ;;  %v47_v9 = vld [vmem:[%s2535_s0 + $0x10] sm:$0xff]  ;;  %v48_v10 = vld [vmem:[%s2535_s0 + $0x18] sm:$0xff]  ;;  %s1424_s25 = smov 113   ;;  %s1425_s26 = smov 127  }
   0x7   :  { %1315 = vset.pattern.permute.xlu2 %v1421_v0  ;;  %126 = vperm.xlu0 %1313, %v59_v1   ;;  %v1493_v4 = vperm.slane %v49_v3, 0  ;;  %v1495_v5 = vperm.slane %v49_v3, 2  ;;  %v1497_v6 = vperm.slane %v49_v3, 3  ;;  %v45_v8 = vld [vmem:[%s2535_s0] sm:$0xff]  ;;  %v1508_v11 = vperm.slane %v49_v3, 1  ;;  %v46_v15 = vld [vmem:[%s2535_s0 + $0x8] sm:$0xff] }
   0x8   :  { %s1422_s0 = smov 111   ;;  %s1426_s27 = smov 1   ;;  %vm353_vm12 = vcmask 588800  }
   0x9   :  { %2555 = vst [vmem:[#allocation5_spill] sm:$0xff] %v1493_v4  ;;  %v1511_v12 = vmul.f32 %v1493_v4, %v45_v8  ;;  %v1514_v13 = vmul.f32 %v1495_v5, %v47_v9  ;;  %v1517_v14 = vmul.f32 %v1497_v6, %v48_v10  ;;  %v1523_v16 = vmul.f32 %v1508_v11, %v46_v15  ;;  %s1427_s28 = smov 15   ;;  %s1428_s29 = smov 16  }
   0xa   :  { %2556 = vst [vmem:[#allocation6_spill] sm:$0xff] %v1495_v5  ;;  %s1429_s30 = smov 17   ;;  %s1431_s9 = smov 120  }
   0xb   :  { %2557 = vst [vmem:[#allocation7_spill] sm:$0xff] %v1497_v6  ;;  %s1432_s10 = smov 119   ;;  %s1433_s12 = smov 7  }
   0xc   :  { %2558 = vst [vmem:[#allocation8_spill] sm:$0xff] %v1508_v11  ;;  %s1434_s14 = smov 9  }
   0xd   :  { %2559 = vst [vmem:[#allocation9_spill] sm:$0xff] %v1511_v12 }
   0xe   :  { %2560 = vst [vmem:[#allocation10_spill] sm:$0xff] %v1517_v14 }
   0xf   :  { %135 = vperm.xlu0 %1313, %v60_v2   ;;  %2561 = vst [vmem:[#allocation11_spill] sm:$0xff] %v1523_v16 }
  0x79   :  { %v127_v7 = vpop.permute.xlu0 %126 }
  0x7a   :  { %v129_v17 = vmul.f32 %v127_v7, %v1511_v12  ;;  %v131_v18 = vmul.f32 %v127_v7, %v1514_v13  ;;  %v132_v19 = vmul.f32 %v127_v7, %v1517_v14  ;;  %v130_v24 = vmul.f32 %v127_v7, %v1523_v16 }
  0x81   :  { %v136_v20 = vpop.permute.xlu0 %135 }
  0x82   :  { %v138_v21 = vadd.f32 %v136_v20, %v129_v17  ;;  %v140_v22 = vadd.f32 %v136_v20, %v131_v18  ;;  %v1528_v23 = vadd.f32 %v136_v20, %v132_v19  ;;  %v1532_v28 = vadd.f32 %v136_v20, %v130_v24 }
  0x84   :  { %v142_v25 = vand.u32 2147483647, %v138_v21  ;;  %v144_v26 = vand.u32 2147483647, %v140_v22  ;;  %v145_v27 = vand.u32 2147483647, %v1528_v23 }
  0x85   :  { %v143_v35 = vand.u32 2147483647, %v1532_v28  ;;  %vm162_vm0 = vcmp.ge.f32.partialorder %v138_v21, 0.0  ;;  %vm164_vm1 = vcmp.ge.f32.partialorder %v140_v22, 0.0  ;;  %vm165_vm2 = vcmp.ge.f32.partialorder %v1528_v23, 0.0 }
  0x86   :  { %v146_v29 = vsub.f32 0.0, %v142_v25  ;;  %v148_v30 = vsub.f32 0.0, %v144_v26  ;;  %v149_v31 = vsub.f32 0.0, %v145_v27  ;;  %vm163_vm3 = vcmp.ge.f32.partialorder %v1532_v28, 0.0 }
  0x87   :  { %v147_v36 = vsub.f32 0.0, %v143_v35 }
  0x88   :  { %v150_v32 = vmul.f32 1.442695, %v146_v29  ;;  %v154_v33 = vmul.f32 1.442695, %v148_v30  ;;  %v156_v34 = vmul.f32 1.442695, %v149_v31 }
  0x89   :  { %v152_v40 = vmul.f32 1.442695, %v147_v36  ;;  %v1624_v36 = vld [vmem:[%s2539_s4 + $0x118] sm:$0xff] }
  0x8a   :  { %1316 = vpow2.f32 %v150_v32 }
  0x8b   :  { %1318 = vpow2.f32 %v154_v33  ;;  %v214_v33 = vlaneseq }
  0x8c   :  { %1320 = vpow2.f32 %v156_v34 }
  0x8d   :  { %v1616_v34 = vand.u32 127, %v214_v33 }
  0x8f   :  { %vm307_vm4 = vcmp.lt.s32.totalorder %v1616_v34, 111  ;;  %vm294_vm5 = vcmp.lt.s32.totalorder %v1616_v34, 112  ;;  %vm281_vm6 = vcmp.lt.s32.totalorder %v1616_v34, 113  ;;  %vm268_vm7 = vcmp.lt.s32.totalorder %v1616_v34, 127 }
  0x90   :  { %v1317_v37 = vpop.eup %1316  ;;  %vm255_vm8 = vcmp.lt.s32.totalorder %v1616_v34, 1  ;;  %vm242_vm9 = vcmp.lt.s32.totalorder %v1616_v34, 15  ;;  %vm229_vm10 = vcmp.lt.s32.totalorder %v1616_v34, 16  ;;  %vm216_vm11 = vcmp.lt.s32.totalorder %v1616_v34, 17  ;;  %v790_v34 = vld [vmem:[#allocation2 + $0x158] sm:$0xff] }
  0x91   :  { %v158_v38 = vadd.f32 1.0, %v1317_v37  ;;  %v1319_v39 = vpop.eup %1318  ;;  %v166_v47 = vmul.f32 %v1317_v37, %v1317_v37 }
  0x92   :  { %v1321_v41 = vpop.eup %1320  ;;  %v160_v42 = vadd.f32 1.0, %v1319_v39  ;;  %v168_v48 = vmul.f32 %v1319_v39, %v1319_v39 }
  0x93   :  { %v174_v43 = vmul.f32 %v158_v38, %v158_v38  ;;  %v161_v44 = vadd.f32 1.0, %v1321_v41  ;;  %v169_v49 = vmul.f32 %v1321_v41, %v1321_v41  ;;  %v170_v51 = vsel %vm162_vm0, %v166_v47, 1.0  ;;  %v1648_v47 = vld [vmem:[%s2539_s4 + $0x108] sm:$0xff] }
  0x94   :  { %v176_v45 = vmul.f32 %v160_v42, %v160_v42  ;;  %v172_v55 = vsel %vm164_vm1, %v168_v48, 1.0  ;;  %v1634_v42 = vld [vmem:[%s2539_s4 + $0x110] sm:$0xff] }
  0x95   :  { %1322 = vrcp.f32 %v174_v43  ;;  %v177_v46 = vmul.f32 %v161_v44, %v161_v44  ;;  %v173_v57 = vsel %vm165_vm2, %v169_v49, 1.0 }
  0x96   :  { %1324 = vpow2.f32 %v152_v40 }
  0x97   :  { %1326 = vrcp.f32 %v176_v45 }
  0x98   :  { %1328 = vrcp.f32 %v177_v46  ;;  %v1643_v46 = vld [vmem:[%s2539_s4 + $0x100] sm:$0xff] }
  0x9b   :  { %v1323_v50 = vpop.eup %1322 }
  0x9c   :  { %v1325_v52 = vpop.eup %1324  ;;  %v182_v53 = vmul.f32 %v1323_v50, %v170_v51 }
  0x9d   :  { %v1327_v54 = vpop.eup %1326  ;;  %v159_v60 = vadd.f32 1.0, %v1325_v52  ;;  %v167_v24 = vmul.f32 %v1325_v52, %v1325_v52 }
  0x9e   :  { %v1329_v56 = vpop.eup %1328  ;;  %v184_v58 = vmul.f32 %v1327_v54, %v172_v55  ;;  %v194_v59 = vadd.f32 1.0, %v182_v53  ;;  %v186_v63 = vsub.f32 1.0, %v182_v53  ;;  %v1661_v54 = vld [vmem:[%s2539_s4 + $0xf0] sm:$0xff]  ;;  %v1666_v55 = vld [vmem:[%s2539_s4 + $0xf8] sm:$0xff] }
  0x9f   :  { %v185_v61 = vmul.f32 %v1329_v56, %v173_v57  ;;  %v175_v1 = vmul.f32 %v159_v60, %v159_v60 }
  0xa0   :  { %v196_v62 = vadd.f32 1.0, %v184_v58  ;;  %1330 = vrcp.f32 %v194_v59  ;;  %v188_v2 = vsub.f32 1.0, %v184_v58  ;;  %v190_v7 = vmul.f32 %v186_v63, %v138_v21  ;;  %v1686_v63 = vld [vmem:[%s2539_s4 + $0xd8] sm:$0xff] }
  0xa1   :  { %v197_v0 = vadd.f32 1.0, %v185_v61  ;;  %v189_v3 = vsub.f32 1.0, %v185_v61 }
  0xa2   :  { %1332 = vrcp.f32 %v196_v62  ;;  %v192_v9 = vmul.f32 %v188_v2, %v140_v22  ;;  %v171_v22 = vsel %vm163_vm3, %v167_v24, 1.0  ;;  %v1681_v62 = vld [vmem:[%s2539_s4 + $0xd0] sm:$0xff] }
  0xa3   :  { %1334 = vrcp.f32 %v197_v0  ;;  %v193_v17 = vmul.f32 %v189_v3, %v1528_v23 }
  0xa4   :  { %1336 = vrcp.f32 %v175_v1 }
  0xa6   :  { %v1331_v8 = vpop.eup %1330 }
  0xa7   :  { %v1536_v10 = vmul.f32 %v1331_v8, %v190_v7 }
  0xa8   :  { %v1333_v15 = vpop.eup %1332 }
  0xa9   :  { %v1335_v18 = vpop.eup %1334  ;;  %v1539_v19 = vmul.f32 %v1333_v15, %v192_v9  ;;  %299 = vrot.lane.b32.xlu1 %v1536_v10, %s1422_s0  ;;  %v1704_v15 = vld [vmem:[%s2539_s4 + $0xb0] sm:$0xff] }
  0xaa   :  { %v1543_v20 = vmul.f32 %v1335_v18, %v193_v17  ;;  %v1337_v21 = vpop.eup %1336  ;;  %v1709_v17 = vld [vmem:[%s2539_s4 + $0xb8] sm:$0xff] }
  0xab   :  { %290 = vrot.lane.b32.xlu0 %v1539_v19, %s1423_s24  ;;  %v183_v23 = vmul.f32 %v1337_v21, %v171_v22  ;;  %v1720_v22 = vld [vmem:[%s2539_s4 + $0xe0] sm:$0xff] }
  0xac   :  { %305 = vrot.lane.b32.xlu2 %v1543_v20, %s1422_s0 }
  0xad   :  { %v195_v25 = vadd.f32 1.0, %v183_v23  ;;  %v187_v26 = vsub.f32 1.0, %v183_v23  ;;  %v1725_v23 = vld [vmem:[%s2539_s4 + $0xe8] sm:$0xff] }
  0xaf   :  { %1338 = vrcp.f32 %v195_v25  ;;  %v191_v29 = vmul.f32 %v187_v26, %v1532_v28  ;;  %v63_v28 = vld [vmem:[%s2541_s6 + $0x20] sm:$0xff] }
  0xb1   :  { %303 = vrot.lane.b32.xlu1 %v1539_v19, %s1422_s0 }
  0xb3   :  { %277 = vrot.lane.b32.xlu0 %v1539_v19, %s1424_s25 }
  0xb4   :  { %286 = vrot.lane.b32.xlu2 %v1536_v10, %s1423_s24 }
  0xb5   :  { %v1339_v27 = vpop.eup %1338 }
  0xb6   :  { %v1563_v30 = vmul.f32 %v1339_v27, %v191_v29 }
  0xb9   :  { %292 = vrot.lane.b32.xlu1 %v1543_v20, %s1423_s24 }
  0xbb   :  { %264 = vrot.lane.b32.xlu0 %v1539_v19, %s1425_s26 }
  0xbc   :  { %273 = vrot.lane.b32.xlu2 %v1536_v10, %s1424_s25 }
  0xc1   :  { %279 = vrot.lane.b32.xlu1 %v1543_v20, %s1424_s25 }
  0xc3   :  { %249 = vrot.lane.b32.xlu0 %v1563_v30, %s1426_s27 }
  0xc4   :  { %260 = vrot.lane.b32.xlu2 %v1536_v10, %s1425_s26 }
  0xc9   :  { %266 = vrot.lane.b32.xlu1 %v1543_v20, %s1425_s26 }
  0xcb   :  { %288 = vrot.lane.b32.xlu0 %v1563_v30, %s1423_s24 }
  0xcc   :  { %301 = vrot.lane.b32.xlu2 %v1563_v30, %s1422_s0 }
  0xd1   :  { %251 = vrot.lane.b32.xlu1 %v1539_v19, %s1426_s27 }
  0xd3   :  { %240 = vrot.lane.b32.xlu0 %v1543_v20, %s1427_s28 }
  0xd4   :  { %253 = vrot.lane.b32.xlu2 %v1543_v20, %s1426_s27 }
  0xd9   :  { %236 = vrot.lane.b32.xlu1 %v1563_v30, %s1427_s28 }
  0xdb   :  { %225 = vrot.lane.b32.xlu0 %v1539_v19, %s1428_s29 }
  0xdc   :  { %238 = vrot.lane.b32.xlu2 %v1539_v19, %s1427_s28 }
  0xe1   :  { %275 = vrot.lane.b32.xlu1 %v1563_v30, %s1424_s25 }
  0xe3   :  { %208 = vrot.lane.b32.xlu0 %v1563_v30, %s1429_s30 }
  0xe4   :  { %223 = vrot.lane.b32.xlu2 %v1563_v30, %s1428_s29 }
  0xe9   :  { %227 = vrot.lane.b32.xlu1 %v1543_v20, %s1428_s29 }
  0xeb   :  { %247 = vrot.lane.b32.xlu0 %v1536_v10, %s1426_s27 }
  0xec   :  { %262 = vrot.lane.b32.xlu2 %v1563_v30, %s1425_s26 }
  0xf1   :  { %210 = vrot.lane.b32.xlu1 %v1539_v19, %s1429_s30 }
  0xf3   :  { %206 = vrot.lane.b32.xlu0 %v1536_v10, %s1429_s30 }
  0xf4   :  { %212 = vrot.lane.b32.xlu2 %v1543_v20, %s1429_s30 }
  0xf9   :  { %234 = vrot.lane.b32.xlu1 %v1536_v10, %s1427_s28 }
  0xfb   :  { %452 = vperm.xlu0 %1313, %v63_v28   ;;  %v1732_v28 = vld [vmem:[%s2539_s4 + $0x90] sm:$0xff] }
  0xfc   :  { %221 = vrot.lane.b32.xlu2 %v1536_v10, %s1428_s29 }
 0x106   :  { %v306_v31 = vpop.permute.xlu2 %305 }
 0x10e   :  { %v1614_v32 = vpop.permute.xlu2 %286 }
 0x116   :  { %v1618_v35 = vpop.permute.xlu2 %273 }
 0x11b   :  { %v300_v37 = vpop.permute.xlu1 %299 }
 0x11c   :  { %v311_v38 = vsel %vm307_vm4, %v306_v31, %v300_v37 }
 0x11d   :  { %v291_v39 = vpop.permute.xlu0 %290  ;;  %v347_v40 = vmul.f32 %v311_v38, %v1624_v36 }
 0x11e   :  { %v1629_v41 = vpop.permute.xlu2 %260 }
 0x11f   :  { %424 = vmatpush.msra.mxu3 %v347_v40 }
 0x123   :  { %v304_v43 = vpop.permute.xlu1 %303 }
 0x124   :  { %v308_v44 = vsel %vm307_vm4, %v304_v43, %v306_v31  ;;  %v1737_v31 = vld [vmem:[%s2539_s4 + $0x98] sm:$0xff] }
 0x125   :  { %v1638_v45 = vpop.permute.xlu0 %277  ;;  %v346_v48 = vmul.f32 %v308_v44, %v1634_v42  ;;  %v331_v44 = vmul.f32 %v1543_v20, %v1737_v31 }
 0x126   :  { %v302_v49 = vpop.permute.xlu2 %301 }
 0x127   :  { %v310_v50 = vsel %vm307_vm4, %v300_v37, %v302_v49  ;;  %v309_v51 = vsel %vm307_vm4, %v302_v49, %v304_v43  ;;  %404 = vmatpush.msra.mxu2 %v346_v48  ;;  %v330_v43 = vmul.f32 %v1539_v19, %v1732_v28  ;;  %v1771_v49 = vld [vmem:[%s2539_s4 + $0x58] sm:$0xff] }
 0x128   :  { %v344_v52 = vmul.f32 %v310_v50, %v1643_v46  ;;  %v345_v53 = vmul.f32 %v309_v51, %v1648_v47 }
 0x12a   :  { %364 = vmatpush.msra.mxu0 %v344_v52  ;;  %384 = vmatpush.msra.mxu1 %v345_v53 }
 0x12b   :  { %v293_v56 = vpop.permute.xlu1 %292 }
 0x12c   :  { %v295_v57 = vsel %vm294_vm5, %v291_v39, %v293_v56  ;;  %v298_v58 = vsel %vm294_vm5, %v293_v56, %v1614_v32 }
 0x12d   :  { %v1673_v59 = vpop.permute.xlu0 %264  ;;  %v342_v60 = vmul.f32 %v295_v57, %v1661_v54  ;;  %v343_v61 = vmul.f32 %v298_v58, %v1666_v55  ;;  %v1786_v58 = vld [vmem:[%s2539_s4 + $0x50] sm:$0xff] }
 0x12e   :  { %v1688_v0 = vpop.permute.xlu2 %253 }
 0x12f   :  { %405 = vmatpush.msra.mxu2 %v342_v60  ;;  %425 = vmatpush.msra.mxu3 %v343_v61 }
 0x133   :  { %v280_v1 = vpop.permute.xlu1 %279 }
 0x134   :  { %v282_v2 = vsel %vm281_vm6, %v1638_v45, %v280_v1  ;;  %v285_v3 = vsel %vm281_vm6, %v280_v1, %v1618_v35  ;;  %v1797_v1 = vld [vmem:[%s2539_s4 + $0x30] sm:$0xff] }
 0x135   :  { %v1696_v7 = vpop.permute.xlu0 %249  ;;  %v338_v8 = vmul.f32 %v282_v2, %v1681_v62  ;;  %v339_v9 = vmul.f32 %v285_v3, %v1686_v63 }
 0x136   :  { %v239_v25 = vpop.permute.xlu2 %238 }
 0x137   :  { %406 = vmatpush.msra.mxu2 %v338_v8  ;;  %426 = vmatpush.msra.mxu3 %v339_v9 }
 0x13b   :  { %v267_v18 = vpop.permute.xlu1 %266 }
 0x13c   :  { %v269_v24 = vsel %vm268_vm7, %v1673_v59, %v267_v18  ;;  %v272_v21 = vsel %vm268_vm7, %v267_v18, %v1629_v41 }
 0x13d   :  { %v289_v26 = vpop.permute.xlu0 %288  ;;  %v334_v27 = vmul.f32 %v269_v24, %v1704_v15  ;;  %v335_v29 = vmul.f32 %v272_v21, %v1709_v17  ;;  %v1807_v24 = vld [vmem:[%s2539_s4 + $0xc0] sm:$0xff]  ;;  %v1812_v21 = vld [vmem:[%s2539_s4 + $0xc8] sm:$0xff] }
 0x13e   :  { %v296_v33 = vsel %vm294_vm5, %v289_v26, %v291_v39  ;;  %v297_v37 = vsel %vm294_vm5, %v1614_v32, %v289_v26  ;;  %v1754_v32 = vld [vmem:[%s2539_s4 + $0x70] sm:$0xff]  ;;  %v1759_v39 = vld [vmem:[%s2539_s4 + $0x78] sm:$0xff]  ;;  %v1780_v56 = vpop.permute.xlu2 %223  ;;  %v1817_v26 = vld [vmem:[%s2539_s4 + $0xa0] sm:$0xff] }
 0x13f   :  { %v340_v38 = vmul.f32 %v297_v37, %v1720_v22  ;;  %v341_v40 = vmul.f32 %v296_v33, %v1725_v23  ;;  %407 = vmatpush.msra.mxu2 %v334_v27  ;;  %427 = vmatpush.msra.mxu3 %v335_v29 }
 0x141   :  { %365 = vmatpush.msra.mxu0 %v340_v38  ;;  %385 = vmatpush.msra.mxu1 %v341_v40  ;;  %v1834_v38 = vld [vmem:[%s2539_s4 + $0xa8] sm:$0xff] }
 0x142   :  { %408 = vmatpush.msra.mxu2 %v330_v43  ;;  %428 = vmatpush.msra.mxu3 %v331_v44  ;;  %v1852_v44 = vld [vmem:[%s2539_s4 + $0x80] sm:$0xff] }
 0x143   :  { %v252_v19 = vpop.permute.xlu1 %251 }
 0x144   :  { %v256_v20 = vsel %vm255_vm8, %v252_v19, %v1688_v0  ;;  %v257_v48 = vsel %vm255_vm8, %v1696_v7, %v252_v19 }
 0x145   :  { %v1773_v50 = vpop.permute.xlu0 %240  ;;  %v326_v51 = vmul.f32 %v257_v48, %v1754_v32  ;;  %v327_v52 = vmul.f32 %v256_v20, %v1759_v39 }
 0x146   :  { %v243_v53 = vsel %vm242_vm9, %v239_v25, %v1773_v50  ;;  %v263_v18 = vpop.permute.xlu2 %262 }
 0x147   :  { %409 = vmatpush.msra.mxu2 %v326_v51  ;;  %429 = vmatpush.msra.mxu3 %v327_v52  ;;  %v323_v57 = vmul.f32 %v243_v53, %v1771_v49  ;;  %v270_v27 = vsel %vm268_vm7, %v263_v18, %v1673_v59  ;;  %v271_v29 = vsel %vm268_vm7, %v1629_v41, %v263_v18  ;;  %v61_v59 = vld [vmem:[%s2541_s6 + $0x10] sm:$0xff]  ;;  %v62_v41 = vld [vmem:[%s2541_s6 + $0x18] sm:$0xff] }
 0x148   :  { %350 = vperm.xlu1 %1314, %v61_v59   ;;  %443 = vperm.xlu2 %1315, %v62_v41   ;;  %v332_v19 = vmul.f32 %v271_v29, %v1817_v26  ;;  %v333_v20 = vmul.f32 %v270_v27, %v1834_v38  ;;  %v328_v51 = vmul.f32 %v1536_v10, %v1852_v44  ;;  %v1863_v52 = vld [vmem:[%s2539_s4 + $0x38] sm:$0xff]  ;;  %v1875_v10 = vld [vmem:[%s2539_s4 + $0x68] sm:$0xff]  ;;  %v1890_v27 = vld [vmem:[%s2539_s4 + $0x10] sm:$0xff] }
 0x149   :  { %430 = vmatpush.msra.mxu3 %v323_v57  ;;  %v71_v41 = vld [vmem:[%s2542_s7] sm:$0xff] }
 0x14b   :  { %v1789_v60 = vpop.permute.xlu1 %236 }
 0x14c   :  { %v244_v61 = vsel %vm242_vm9, %v1789_v60, %v239_v25 }
 0x14d   :  { %v226_v2 = vpop.permute.xlu0 %225  ;;  %v322_v3 = vmul.f32 %v244_v61, %v1786_v58  ;;  %v1870_v61 = vld [vmem:[%s2539_s4 + $0x60] sm:$0xff] }
 0x14e   :  { %v231_v8 = vsel %vm229_vm10, %v1780_v56, %v226_v2 }
 0x14f   :  { %410 = vmatpush.msra.mxu2 %v322_v3  ;;  %v318_v9 = vmul.f32 %v231_v8, %v1797_v1 }
 0x151   :  { %411 = vmatpush.msra.mxu2 %v318_v9  ;;  %v213_v9 = vpop.permute.xlu2 %212 }
 0x153   :  { %v276_v25 = vpop.permute.xlu1 %275 }
 0x154   :  { %v283_v33 = vsel %vm281_vm6, %v276_v25, %v1638_v45  ;;  %v284_v37 = vsel %vm281_vm6, %v1618_v35, %v276_v25  ;;  %v1847_v35 = vld [vmem:[%s2539_s4 + $0x88] sm:$0xff] }
 0x155   :  { %v209_v40 = vpop.permute.xlu0 %208  ;;  %v336_v45 = vmul.f32 %v284_v37, %v1807_v24  ;;  %v337_v43 = vmul.f32 %v283_v33, %v1812_v21  ;;  %v329_v48 = vmul.f32 %v1563_v30, %v1847_v35 }
 0x157   :  { %366 = vmatpush.msra.mxu0 %v336_v45  ;;  %386 = vmatpush.msra.mxu1 %v337_v43  ;;  %v1911_v43 = vld [vmem:[%s2539_s4 + $0x40] sm:$0xff] }
 0x159   :  { %367 = vmatpush.msra.mxu0 %v332_v19  ;;  %387 = vmatpush.msra.mxu1 %v333_v20  ;;  %v222_v45 = vpop.permute.xlu2 %221  ;;  %v1916_v19 = vld [vmem:[%s2539_s4 + $0x48] sm:$0xff] }
 0x15b   :  { %388 = vmatpush.msra.mxu1 %v329_v48  ;;  %v228_v53 = vpop.permute.xlu1 %227  ;;  %368 = vmatpush.msra.mxu0 %v328_v51  ;;  %v232_v51 = vsel %vm229_vm10, %v222_v45, %v1780_v56  ;;  %v1937_v56 = vld [vmem:[%s2539_s4 + $0x28] sm:$0xff] }
 0x15c   :  { %v230_v57 = vsel %vm229_vm10, %v226_v2, %v228_v53 }
 0x15d   :  { %v248_v30 = vpop.permute.xlu0 %247  ;;  %v319_v3 = vmul.f32 %v230_v57, %v1863_v52  ;;  %v233_v57 = vsel %vm229_vm10, %v228_v53, %v222_v45 }
 0x15e   :  { %v258_v8 = vsel %vm255_vm8, %v248_v30, %v1696_v7  ;;  %v259_v2 = vsel %vm255_vm8, %v1688_v0, %v248_v30  ;;  %v1895_v7 = vld [vmem:[%s2539_s4 + $0x18] sm:$0xff] }
 0x15f   :  { %v324_v18 = vmul.f32 %v259_v2, %v1870_v61  ;;  %v325_v25 = vmul.f32 %v258_v8, %v1875_v10  ;;  %431 = vmatpush.msra.mxu3 %v319_v3  ;;  %v1932_v8 = vld [vmem:[%s2539_s4 + $0x20] sm:$0xff] }
 0x161   :  { %369 = vmatpush.msra.mxu0 %v324_v18  ;;  %389 = vmatpush.msra.mxu1 %v325_v25  ;;  %v1948_v18 = vld [vmem:[%s2539_s4] sm:$0xff]  ;;  %v1953_v25 = vld [vmem:[%s2539_s4 + $0x8] sm:$0xff] }
 0x163   :  { %v211_v0 = vpop.permute.xlu1 %210 }
 0x164   :  { %v217_v29 = vsel %vm216_vm11, %v211_v0, %v213_v9  ;;  %v218_v33 = vsel %vm216_vm11, %v209_v40, %v211_v0  ;;  %v316_v0 = vmul.f32 %v233_v57, %v1932_v8 }
 0x165   :  { %v314_v37 = vmul.f32 %v218_v33, %v1890_v27  ;;  %v315_v59 = vmul.f32 %v217_v29, %v1895_v7  ;;  %v207_v20 = vpop.permute.xlu0 %206  ;;  %v317_v29 = vmul.f32 %v232_v51, %v1937_v56 }
 0x167   :  { %412 = vmatpush.msra.mxu2 %v314_v37  ;;  %432 = vmatpush.msra.mxu3 %v315_v59 }
 0x168   :  { %1288 = vmatmul.msk.f32.vlgmr.msra.gmra.mxu2 %vm353_vm12, %v71_v41  ;;  %1289 = vmatmul.msk.f32.vlgmr.msra.gmra.mxu3 %vm353_vm12, %v71_v41 }
 0x16b   :  { %v235_v48 = vpop.permute.xlu1 %234 }
 0x16c   :  { %v245_v30 = vsel %vm242_vm9, %v235_v48, %v1789_v60  ;;  %v246_v3 = vsel %vm242_vm9, %v1773_v50, %v235_v48  ;;  %v219_v60 = vsel %vm216_vm11, %v207_v20, %v209_v40  ;;  %v220_v50 = vsel %vm216_vm11, %v213_v9, %v207_v20 }
 0x16d   :  { %v320_v53 = vmul.f32 %v246_v3, %v1911_v43  ;;  %v321_v2 = vmul.f32 %v245_v30, %v1916_v19  ;;  %v312_v40 = vmul.f32 %v220_v50, %v1948_v18  ;;  %v313_v9 = vmul.f32 %v219_v60, %v1953_v25 }
 0x16f   :  { %370 = vmatpush.msra.mxu0 %v320_v53  ;;  %390 = vmatpush.msra.mxu1 %v321_v2  ;;  %v453_v2 = vpop.permute.xlu0 %452 }
 0x171   :  { %371 = vmatpush.msra.mxu0 %v316_v0  ;;  %391 = vmatpush.msra.mxu1 %v317_v29 }
 0x173   :  { %372 = vmatpush.msra.mxu0 %v312_v40  ;;  %392 = vmatpush.msra.mxu1 %v313_v9 }
 0x174   :  { %1286 = vmatmul.msk.f32.vlgmr.msra.gmra.mxu0 %vm353_vm12, %v71_v41  ;;  %1287 = vmatmul.msk.f32.vlgmr.msra.gmra.mxu1 %vm353_vm12, %v71_v41 }
 0x1a2   :  { %v444_v30 = vpop.permute.xlu2 %443 }
 0x1ba   :  { %v351_v33 = vpop.permute.xlu1 %350 }
 0x1eb   :  { %v414_v48 = vpop.f32.mrf.mxu2  ;;  %v434_v41 = vpop.f32.mrf.mxu3 }
 0x1ec   :  { %v415_v60 = vadd.f32 %v414_v48, %v351_v33 }
 0x1ee   :  { %v439_v9 = vmul.f32 %v415_v60, %v1495_v5 }
 0x1f1   :  { %v374_v37 = vpop.f32.mrf.mxu0  ;;  %v394_v59 = vpop.f32.mrf.mxu1 }
 0x1f2   :  { %v375_v45 = vadd.f32 %v374_v37, %v351_v33  ;;  %v395_v20 = vadd.f32 %v394_v59, %v351_v33  ;;  %v435_v59 = vadd.f32 %v434_v41, %v351_v33 }
 0x1f4   :  { %v437_v51 = vmul.f32 %v375_v45, %v1493_v4  ;;  %v438_v57 = vmul.f32 %v395_v20, %v1508_v11  ;;  %v448_v45 = vmul.f32 %v444_v30, %v439_v9  ;;  %v440_v20 = vmul.f32 %v435_v59, %v1497_v6 }
 0x1f6   :  { %v446_v3 = vmul.f32 %v444_v30, %v437_v51  ;;  %v447_v53 = vmul.f32 %v444_v30, %v438_v57  ;;  %v1965_v51 = vadd.f32 %v453_v2, %v448_v45  ;;  %v449_v57 = vmul.f32 %v444_v30, %v440_v20 }
 0x1f8   :  { %v455_v50 = vadd.f32 %v453_v2, %v446_v3  ;;  %v456_v0 = vadd.f32 %v453_v2, %v447_v53  ;;  %v461_v53 = vand.u32 2147483647, %v1965_v51  ;;  %vm481_vm15 = vcmp.ge.f32.partialorder %v1965_v51, 0.0 }
 0x1fa   :  { %v459_v29 = vand.u32 2147483647, %v455_v50  ;;  %v460_v40 = vand.u32 2147483647, %v456_v0  ;;  %vm479_vm13 = vcmp.ge.f32.partialorder %v455_v50, 0.0  ;;  %vm480_vm14 = vcmp.ge.f32.partialorder %v456_v0, 0.0 }
 0x1fc   :  { %v463_v16 = vsub.f32 0.0, %v459_v29  ;;  %v464_v37 = vsub.f32 0.0, %v460_v40  ;;  %v1968_v29 = vadd.f32 %v453_v2, %v449_v57 }
 0x1fe   :  { %v467_v12 = vmul.f32 1.442695, %v463_v16  ;;  %v469_v14 = vmul.f32 1.442695, %v464_v37  ;;  %v465_v16 = vsub.f32 0.0, %v461_v53  ;;  %vm482_vm0 = vcmp.ge.f32.partialorder %v1968_v29, 0.0 }
 0x200   :  { %1340 = vpow2.f32 %v467_v12  ;;  %v471_v41 = vmul.f32 1.442695, %v465_v16 }
 0x201   :  { %1342 = vpow2.f32 %v469_v14  ;;  %v462_v14 = vand.u32 2147483647, %v1968_v29 }
 0x203   :  { %v466_v59 = vsub.f32 0.0, %v462_v14 }
 0x205   :  { %v473_v57 = vmul.f32 1.442695, %v466_v59 }
 0x206   :  { %v1341_v48 = vpop.eup %1340 }
 0x207   :  { %v1343_v3 = vpop.eup %1342  ;;  %v475_v11 = vadd.f32 1.0, %v1341_v48  ;;  %v483_v12 = vmul.f32 %v1341_v48, %v1341_v48 }
 0x208   :  { %v476_v4 = vadd.f32 1.0, %v1343_v3  ;;  %v484_v40 = vmul.f32 %v1343_v3, %v1343_v3 }
 0x209   :  { %v491_v60 = vmul.f32 %v475_v11, %v475_v11  ;;  %v487_v30 = vsel %vm479_vm13, %v483_v12, 1.0 }
 0x20a   :  { %v492_v33 = vmul.f32 %v476_v4, %v476_v4  ;;  %v488_v20 = vsel %vm480_vm14, %v484_v40, 1.0 }
 0x20b   :  { %1344 = vrcp.f32 %v491_v60 }
 0x20c   :  { %1346 = vrcp.f32 %v492_v33 }
 0x20d   :  { %1348 = vpow2.f32 %v471_v41 }
 0x211   :  { %v1345_v9 = vpop.eup %1344 }
 0x212   :  { %v1347_v37 = vpop.eup %1346  ;;  %v499_v45 = vmul.f32 %v1345_v9, %v487_v30 }
 0x213   :  { %v500_v11 = vmul.f32 %v1347_v37, %v488_v20  ;;  %v1349_v60 = vpop.eup %1348 }
 0x214   :  { %v511_v2 = vadd.f32 1.0, %v499_v45  ;;  %v503_v53 = vsub.f32 1.0, %v499_v45  ;;  %v477_v16 = vadd.f32 1.0, %v1349_v60 }
 0x215   :  { %v512_v4 = vadd.f32 1.0, %v500_v11  ;;  %v504_v48 = vsub.f32 1.0, %v500_v11 }
 0x216   :  { %1350 = vrcp.f32 %v511_v2  ;;  %v507_v3 = vmul.f32 %v503_v53, %v455_v50  ;;  %v493_v41 = vmul.f32 %v477_v16, %v477_v16 }
 0x217   :  { %1352 = vrcp.f32 %v512_v4  ;;  %v508_v12 = vmul.f32 %v504_v48, %v456_v0  ;;  %v485_v0 = vmul.f32 %v1349_v60, %v1349_v60 }
 0x218   :  { %1354 = vpow2.f32 %v473_v57 }
 0x219   :  { %1356 = vrcp.f32 %v493_v41  ;;  %v489_v30 = vsel %vm481_vm15, %v485_v0, 1.0 }
 0x21c   :  { %v1351_v33 = vpop.eup %1350 }
 0x21d   :  { %v1353_v6 = vpop.eup %1352  ;;  %v1971_v5 = vmul.f32 %v1351_v33, %v507_v3 }
 0x21e   :  { %v1973_v14 = vmul.f32 %v1353_v6, %v508_v12  ;;  %v1355_v40 = vpop.eup %1354 }
 0x21f   :  { %607 = vrot.lane.b32.xlu2 %v1971_v5, %s1422_s0  ;;  %v478_v50 = vadd.f32 1.0, %v1355_v40  ;;  %v1357_v6 = vpop.eup %1356  ;;  %v486_v59 = vmul.f32 %v1355_v40, %v1355_v40 }
 0x220   :  { %597 = vrot.lane.b32.xlu1 %v1973_v14, %s1423_s24  ;;  %609 = vrot.lane.b32.xlu0 %v1973_v14, %s1422_s0  ;;  %v501_v37 = vmul.f32 %v1357_v6, %v489_v30 }
 0x221   :  { %v494_v9 = vmul.f32 %v478_v50, %v478_v50  ;;  %v490_v11 = vsel %vm482_vm0, %v486_v59, 1.0 }
 0x222   :  { %v513_v20 = vadd.f32 1.0, %v501_v37  ;;  %v505_v4 = vsub.f32 1.0, %v501_v37 }
 0x223   :  { %1358 = vrcp.f32 %v494_v9 }
 0x224   :  { %1360 = vrcp.f32 %v513_v20  ;;  %v509_v48 = vmul.f32 %v505_v4, %v1965_v51  ;;  %v65_v51 = vld [vmem:[%s2541_s6 + $0x30] sm:$0xff] }
 0x227   :  { %595 = vrot.lane.b32.xlu2 %v1971_v5, %s1423_s24 }
 0x228   :  { %561 = vrot.lane.b32.xlu1 %v1973_v14, %s1426_s27  ;;  %583 = vrot.lane.b32.xlu0 %v1971_v5, %s1424_s25 }
 0x229   :  { %v1359_v45 = vpop.eup %1358 }
 0x22a   :  { %v502_v2 = vmul.f32 %v1359_v45, %v490_v11  ;;  %v1361_v53 = vpop.eup %1360 }
 0x22b   :  { %v2002_v60 = vmul.f32 %v1361_v53, %v509_v48 }
 0x22c   :  { %v514_v57 = vadd.f32 1.0, %v502_v2  ;;  %v506_v3 = vsub.f32 1.0, %v502_v2 }
 0x22e   :  { %1362 = vrcp.f32 %v514_v57  ;;  %v510_v16 = vmul.f32 %v506_v3, %v1968_v29  ;;  %v66_v29 = vld [vmem:[%s2541_s6 + $0x38] sm:$0xff] }
 0x22f   :  { %571 = vrot.lane.b32.xlu2 %v1971_v5, %s1425_s26 }
 0x230   :  { %549 = vrot.lane.b32.xlu1 %v1973_v14, %s1427_s28  ;;  %585 = vrot.lane.b32.xlu0 %v1973_v14, %s1424_s25 }
 0x234   :  { %v1363_v33 = vpop.eup %1362 }
 0x235   :  { %v2011_v12 = vmul.f32 %v1363_v33, %v510_v16 }
 0x237   :  { %525 = vrot.lane.b32.xlu2 %v1973_v14, %s1429_s30 }
 0x238   :  { %537 = vrot.lane.b32.xlu1 %v1973_v14, %s1428_s29  ;;  %573 = vrot.lane.b32.xlu0 %v1973_v14, %s1425_s26 }
 0x23f   :  { %547 = vrot.lane.b32.xlu2 %v1971_v5, %s1427_s28 }
 0x240   :  { %559 = vrot.lane.b32.xlu1 %v1971_v5, %s1426_s27  ;;  %599 = vrot.lane.b32.xlu0 %v2002_v60, %s1423_s24 }
 0x247   :  { %613 = vrot.lane.b32.xlu2 %v2011_v12, %s1422_s0 }
 0x248   :  { %611 = vrot.lane.b32.xlu1 %v2002_v60, %s1422_s0  ;;  %587 = vrot.lane.b32.xlu0 %v2002_v60, %s1424_s25 }
 0x24f   :  { %577 = vrot.lane.b32.xlu2 %v2011_v12, %s1425_s26 }
 0x250   :  { %601 = vrot.lane.b32.xlu1 %v2011_v12, %s1423_s24  ;;  %565 = vrot.lane.b32.xlu0 %v2011_v12, %s1426_s27 }
 0x257   :  { %563 = vrot.lane.b32.xlu2 %v2002_v60, %s1426_s27 }
 0x258   :  { %589 = vrot.lane.b32.xlu1 %v2011_v12, %s1424_s25  ;;  %553 = vrot.lane.b32.xlu0 %v2011_v12, %s1427_s28 }
 0x25f   :  { %551 = vrot.lane.b32.xlu2 %v2002_v60, %s1427_s28 }
 0x260   :  { %575 = vrot.lane.b32.xlu1 %v2002_v60, %s1425_s26  ;;  %527 = vrot.lane.b32.xlu0 %v2002_v60, %s1429_s30 }
 0x267   :  { %539 = vrot.lane.b32.xlu2 %v2002_v60, %s1428_s29 }
 0x268   :  { %541 = vrot.lane.b32.xlu1 %v2011_v12, %s1428_s29  ;;  %529 = vrot.lane.b32.xlu0 %v2011_v12, %s1429_s30 }
 0x26f   :  { %523 = vrot.lane.b32.xlu2 %v1971_v5, %s1429_s30  ;;  %s1430_s30 = smov 121  }
 0x270   :  { %535 = vrot.lane.b32.xlu1 %v1971_v5, %s1428_s29  ;;  %893 = vperm.xlu0 %1313, %v65_v51  }
 0x278   :  { %899 = vperm.xlu1 %1314, %v66_v29  }
 0x279   :  { %v608_v40 = vpop.permute.xlu2 %607 }
 0x281   :  { %v596_v41 = vpop.permute.xlu2 %595 }
 0x289   :  { %v2053_v50 = vpop.permute.xlu2 %571 }
 0x291   :  { %v2055_v9 = vpop.permute.xlu2 %525 }
 0x292   :  { %v598_v0 = vpop.permute.xlu1 %597  ;;  %v610_v6 = vpop.permute.xlu0 %609 }
 0x293   :  { %v605_v30 = vsel %vm294_vm5, %v596_v41, %v598_v0  ;;  %v617_v37 = vsel %vm307_vm4, %v608_v40, %v610_v6 }
 0x294   :  { %v651_v59 = vmul.f32 %v617_v37, %v1643_v46  ;;  %v647_v45 = vmul.f32 %v605_v30, %v1720_v22 }
 0x296   :  { %670 = vmatpush.msrb.mxu0 %v651_v59 }
 0x298   :  { %671 = vmatpush.msrb.mxu0 %v647_v45 }
 0x299   :  { %v2063_v20 = vpop.permute.xlu2 %547 }
 0x29a   :  { %v2065_v11 = vpop.permute.xlu1 %561  ;;  %v584_v2 = vpop.permute.xlu0 %583 }
 0x2a1   :  { %v614_v4 = vpop.permute.xlu2 %613 }
 0x2a2   :  { %v2067_v57 = vpop.permute.xlu1 %549  ;;  %v586_v53 = vpop.permute.xlu0 %585  ;;  %v618_v48 = vsel %vm307_vm4, %v614_v4, %v608_v40  ;;  %v635_v40 = vmul.f32 %v1971_v5, %v1852_v44 }
 0x2a3   :  { %v593_v3 = vsel %vm281_vm6, %v584_v2, %v586_v53  ;;  %v654_v46 = vmul.f32 %v618_v48, %v1624_v36 }
 0x2a4   :  { %v643_v22 = vmul.f32 %v593_v3, %v1807_v24 }
 0x2a5   :  { %730 = vmatpush.msrb.mxu3 %v654_v46 }
 0x2a6   :  { %672 = vmatpush.msrb.mxu0 %v643_v22 }
 0x2a9   :  { %v578_v37 = vpop.permute.xlu2 %577 }
 0x2aa   :  { %v2075_v33 = vpop.permute.xlu1 %537  ;;  %v574_v16 = vpop.permute.xlu0 %573 }
 0x2ab   :  { %v581_v51 = vsel %vm268_vm7, %v2053_v50, %v574_v16 }
 0x2ac   :  { %v639_v29 = vmul.f32 %v581_v51, %v1817_v26 }
 0x2ae   :  { %673 = vmatpush.msrb.mxu0 %v639_v29 }
 0x2b0   :  { %674 = vmatpush.msrb.mxu0 %v635_v40 }
 0x2b1   :  { %v564_v22 = vpop.permute.xlu2 %563 }
 0x2b2   :  { %v560_v30 = vpop.permute.xlu1 %559  ;;  %v600_v36 = vpop.permute.xlu0 %599 }
 0x2b3   :  { %v604_v45 = vsel %vm294_vm5, %v598_v0, %v600_v36 }
 0x2b4   :  { %v648_v44 = vmul.f32 %v604_v45, %v1725_v23 }
 0x2ba   :  { %v612_v24 = vpop.permute.xlu1 %611  ;;  %v588_v59 = vpop.permute.xlu0 %587 }
 0x2bb   :  { %v615_v48 = vsel %vm307_vm4, %v612_v24, %v614_v4  ;;  %v616_v3 = vsel %vm307_vm4, %v610_v6, %v612_v24  ;;  %v592_v5 = vsel %vm281_vm6, %v586_v53, %v588_v59  ;;  %v552_v24 = vpop.permute.xlu2 %551 }
 0x2bc   :  { %v652_v26 = vmul.f32 %v616_v3, %v1648_v47  ;;  %v653_v46 = vmul.f32 %v615_v48, %v1634_v42  ;;  %v644_v0 = vmul.f32 %v592_v5, %v1812_v21  ;;  %v638_v3 = vmul.f32 %v2011_v12, %v1737_v31 }
 0x2bd   :  { %v569_v31 = vsel %vm255_vm8, %v560_v30, %v2065_v11  ;;  %v568_v12 = vsel %vm255_vm8, %v2065_v11, %v564_v22  ;;  %v556_v11 = vsel %vm242_vm9, %v2067_v57, %v552_v24 }
 0x2be   :  { %690 = vmatpush.msrb.mxu1 %v652_v26  ;;  %710 = vmatpush.msrb.mxu2 %v653_v46 }
 0x2c0   :  { %691 = vmatpush.msrb.mxu1 %v648_v44 }
 0x2c2   :  { %v602_v51 = vpop.permute.xlu1 %601  ;;  %692 = vmatpush.msrb.mxu1 %v644_v0  ;;  %v566_v4 = vpop.permute.xlu0 %565 }
 0x2c3   :  { %v603_v6 = vsel %vm294_vm5, %v600_v36, %v602_v51  ;;  %v606_v42 = vsel %vm294_vm5, %v602_v51, %v596_v41  ;;  %v570_v47 = vsel %vm255_vm8, %v566_v4, %v560_v30  ;;  %v540_v44 = vpop.permute.xlu2 %539  ;;  %v810_v51 = vld [vmem:[#allocation2 + $0x1f8] sm:$0xff] }
 0x2c4   :  { %v631_v53 = vmul.f32 %v570_v47, %v1870_v61  ;;  %v649_v23 = vmul.f32 %v603_v6, %v1661_v54  ;;  %v650_v29 = vmul.f32 %v606_v42, %v1666_v55  ;;  %v582_v54 = vsel %vm268_vm7, %v578_v37, %v2053_v50  ;;  %v2170_v6 = vld [vmem:[%s2542_s7 + $0x8] sm:$0xff]  ;;  %v793_v42 = vld [vmem:[#allocation2 + $0x170] sm:$0xff] }
 0x2c5   :  { %v808_v47 = vld [vmem:[#allocation2 + $0x1e8] sm:$0xff] }
 0x2c6   :  { %675 = vmatpush.msrb.mxu0 %v631_v53  ;;  %711 = vmatpush.msrb.mxu2 %v649_v23 }
 0x2c7   :  { %731 = vmatpush.msrb.mxu3 %v650_v29 }
 0x2ca   :  { %v590_v21 = vpop.permute.xlu1 %589  ;;  %v554_v40 = vpop.permute.xlu0 %553 }
 0x2cb   :  { %v591_v36 = vsel %vm281_vm6, %v588_v59, %v590_v21  ;;  %v594_v41 = vsel %vm281_vm6, %v590_v21, %v584_v2  ;;  %v558_v61 = vsel %vm242_vm9, %v554_v40, %v2063_v20  ;;  %v642_v59 = vmul.f32 %v582_v54, %v1709_v17  ;;  %v806_v54 = vld [vmem:[#allocation2 + $0x1d8] sm:$0xff] }
 0x2cc   :  { %v627_v55 = vmul.f32 %v558_v61, %v1911_v43  ;;  %v645_v45 = vmul.f32 %v591_v36, %v1681_v62  ;;  %v646_v48 = vmul.f32 %v594_v41, %v1686_v63  ;;  %v567_v2 = vsel %vm255_vm8, %v564_v22, %v566_v4  ;;  %v794_v22 = vld [vmem:[#allocation2 + $0x178] sm:$0xff]  ;;  %v524_v4 = vpop.permute.xlu2 %523 }
 0x2cd   :  { %v555_v50 = vsel %vm242_vm9, %v552_v24, %v554_v40  ;;  %v634_v17 = vmul.f32 %v567_v2, %v1759_v39  ;;  %v636_v39 = vmul.f32 %v1973_v14, %v1847_v35  ;;  %v791_v40 = vld [vmem:[#allocation2 + $0x160] sm:$0xff]  ;;  %v778_v61 = vld [vmem:[#allocation2 + $0xf8] sm:$0xff] }
 0x2ce   :  { %676 = vmatpush.msrb.mxu0 %v627_v55  ;;  %712 = vmatpush.msrb.mxu2 %v645_v45  ;;  %v807_v24 = vld [vmem:[#allocation2 + $0x1e0] sm:$0xff]  ;;  %v789_v55 = vld [vmem:[#allocation2 + $0x150] sm:$0xff] }
 0x2cf   :  { %732 = vmatpush.msrb.mxu3 %v646_v48  ;;  %v805_v45 = vld [vmem:[#allocation2 + $0x1d0] sm:$0xff]  ;;  %v760_v48 = vld [vmem:[#allocation2 + $0x68] sm:$0xff]  ;;  %v759_v2 = vld [vmem:[#allocation2 + $0x60] sm:$0xff] }
 0x2d1   :  { %733 = vmatpush.msrb.mxu3 %v642_v59  ;;  %v776_v59 = vld [vmem:[#allocation2 + $0xe8] sm:$0xff] }
 0x2d2   :  { %v576_v43 = vpop.permute.xlu1 %575  ;;  %v528_v26 = vpop.permute.xlu0 %527 }
 0x2d3   :  { %v579_v62 = vsel %vm268_vm7, %v576_v43, %v578_v37  ;;  %v580_v63 = vsel %vm268_vm7, %v574_v16, %v576_v43  ;;  %734 = vmatpush.msrb.mxu3 %v638_v3  ;;  %v630_v37 = vmul.f32 %v555_v50, %v1771_v49  ;;  %v632_v49 = vmul.f32 %v569_v31, %v1875_v10  ;;  %v775_v3 = vld [vmem:[#allocation2 + $0xe0] sm:$0xff]  ;;  %v785_v31 = vld [vmem:[#allocation2 + $0x130] sm:$0xff] }
 0x2d4   :  { %v640_v46 = vmul.f32 %v580_v63, %v1834_v38  ;;  %v641_v5 = vmul.f32 %v579_v62, %v1704_v15  ;;  %v637_v15 = vmul.f32 %v2002_v60, %v1732_v28  ;;  %v557_v38 = vsel %vm242_vm9, %v2063_v20, %v2067_v57  ;;  %v787_v50 = vld [vmem:[#allocation2 + $0x140] sm:$0xff]  ;;  %v774_v62 = vld [vmem:[#allocation2 + $0xd8] sm:$0xff] }
 0x2d5   :  { %735 = vmatpush.msrb.mxu3 %v634_v17  ;;  %v633_v16 = vmul.f32 %v568_v12, %v1754_v32  ;;  %v544_v28 = vsel %vm229_vm10, %v2075_v33, %v540_v44  ;;  %v628_v60 = vmul.f32 %v557_v38, %v1916_v19  ;;  %v629_v20 = vmul.f32 %v556_v11, %v1786_v58  ;;  %v803_v43 = vld [vmem:[#allocation2 + $0x1c0] sm:$0xff]  ;;  %v786_v63 = vld [vmem:[#allocation2 + $0x138] sm:$0xff]  ;;  %v801_v12 = vld [vmem:[#allocation2 + $0x1b0] sm:$0xff] }
 0x2d6   :  { %693 = vmatpush.msrb.mxu1 %v640_v46  ;;  %713 = vmatpush.msrb.mxu2 %v641_v5  ;;  %v532_v57 = vsel %vm216_vm11, %v2055_v9, %v528_v26  ;;  %v625_v30 = vmul.f32 %v544_v28, %v1797_v1  ;;  %v809_v1 = vld [vmem:[#allocation2 + $0x1f0] sm:$0xff]  ;;  %v802_v17 = vld [vmem:[#allocation2 + $0x1b8] sm:$0xff]  ;;  %v755_v38 = vld [vmem:[#allocation2 + $0x40] sm:$0xff] }
 0x2d7   :  { %736 = vmatpush.msrb.mxu3 %v630_v37  ;;  %v621_v58 = vmul.f32 %v532_v57, %v1890_v27  ;;  %v757_v46 = vld [vmem:[#allocation2 + $0x50] sm:$0xff]  ;;  %v772_v37 = vld [vmem:[#allocation2 + $0xc8] sm:$0xff]  ;;  %v771_v11 = vld [vmem:[#allocation2 + $0xc0] sm:$0xff] }
 0x2d8   :  { %694 = vmatpush.msrb.mxu1 %v636_v39  ;;  %714 = vmatpush.msrb.mxu2 %v637_v15  ;;  %v773_v5 = vld [vmem:[#allocation2 + $0xd0] sm:$0xff]  ;;  %v784_v39 = vld [vmem:[#allocation2 + $0x128] sm:$0xff]  ;;  %v754_v28 = vld [vmem:[#allocation2 + $0x38] sm:$0xff] }
 0x2d9   :  { %v800_v15 = vld [vmem:[#allocation2 + $0x1a8] sm:$0xff]  ;;  %v769_v57 = vld [vmem:[#allocation2 + $0xb0] sm:$0xff] }
 0x2da   :  { %v542_v35 = vpop.permute.xlu1 %541  ;;  %695 = vmatpush.msrb.mxu1 %v632_v49  ;;  %v530_v14 = vpop.permute.xlu0 %529  ;;  %715 = vmatpush.msrb.mxu2 %v633_v16  ;;  %v783_v49 = vld [vmem:[#allocation2 + $0x120] sm:$0xff] }
 0x2db   :  { %v543_v10 = vsel %vm229_vm10, %v540_v44, %v542_v35  ;;  %v531_v32 = vsel %vm216_vm11, %v528_v26, %v530_v14  ;;  %v534_v53 = vsel %vm216_vm11, %v530_v14, %v524_v4  ;;  %v758_v26 = vld [vmem:[#allocation2 + $0x58] sm:$0xff]  ;;  %v756_v44 = vld [vmem:[#allocation2 + $0x48] sm:$0xff]  ;;  %v799_v16 = vld [vmem:[#allocation2 + $0x1a0] sm:$0xff] }
 0x2dc   :  { %696 = vmatpush.msrb.mxu1 %v628_v60  ;;  %716 = vmatpush.msrb.mxu2 %v629_v20  ;;  %v626_v0 = vmul.f32 %v543_v10, %v1863_v52  ;;  %v622_v19 = vmul.f32 %v531_v32, %v1895_v7  ;;  %v533_v52 = vsel %vm216_vm11, %v524_v4, %v2055_v9  ;;  %v792_v7 = vld [vmem:[#allocation2 + $0x168] sm:$0xff]  ;;  %v782_v14 = vld [vmem:[#allocation2 + $0x118] sm:$0xff]  ;;  %v753_v20 = vld [vmem:[#allocation2 + $0x30] sm:$0xff] }
 0x2dd   :  { %v619_v36 = vmul.f32 %v534_v53, %v1948_v18  ;;  %v620_v41 = vmul.f32 %v533_v52, %v1953_v25  ;;  %v788_v18 = vld [vmem:[#allocation2 + $0x148] sm:$0xff]  ;;  %v798_v60 = vld [vmem:[#allocation2 + $0x198] sm:$0xff]  ;;  %v781_v10 = vld [vmem:[#allocation2 + $0x110] sm:$0xff] }
 0x2de   :  { %717 = vmatpush.msrb.mxu2 %v625_v30  ;;  %737 = vmatpush.msrb.mxu3 %v626_v0  ;;  %v804_v25 = vld [vmem:[#allocation2 + $0x1c8] sm:$0xff]  ;;  %v750_v4 = vld [vmem:[#allocation2 + $0x18] sm:$0xff]  ;;  %v749_v52 = vld [vmem:[#allocation2 + $0x10] sm:$0xff] }
 0x2df   :  { %v752_v32 = vld [vmem:[#allocation2 + $0x28] sm:$0xff] }
 0x2e0   :  { %718 = vmatpush.msrb.mxu2 %v621_v58  ;;  %738 = vmatpush.msrb.mxu3 %v622_v19  ;;  %v768_v30 = vld [vmem:[#allocation2 + $0xa8] sm:$0xff]  ;;  %v751_v58 = vld [vmem:[#allocation2 + $0x20] sm:$0xff] }
 0x2e1   :  { %1292 = vmatmul.msk.f32.vlgmr.msrb.gmra.mxu2 %vm353_vm12, %v2170_v6  ;;  %1293 = vmatmul.msk.f32.vlgmr.msrb.gmra.mxu3 %vm353_vm12, %v2170_v6  ;;  %v780_v0 = vld [vmem:[#allocation2 + $0x108] sm:$0xff]  ;;  %v767_v19 = vld [vmem:[#allocation2 + $0xa0] sm:$0xff] }
 0x2e2   :  { %851 = vmatpush.msra.mxu2 %v794_v22  ;;  %871 = vmatpush.msra.mxu3 %v810_v51  ;;  %v536_v27 = vpop.permute.xlu1 %535  ;;  %v797_v22 = vld [vmem:[#allocation2 + $0x190] sm:$0xff]  ;;  %v779_v51 = vld [vmem:[#allocation2 + $0x100] sm:$0xff]  ;;  %v764_v53 = vld [vmem:[#allocation2 + $0x88] sm:$0xff] }
 0x2e3   :  { %v545_v23 = vsel %vm229_vm10, %v536_v27, %v2075_v33  ;;  %v546_v29 = vsel %vm229_vm10, %v542_v35, %v536_v27  ;;  %v762_v33 = vld [vmem:[#allocation2 + $0x78] sm:$0xff]  ;;  %v765_v27 = vld [vmem:[#allocation2 + $0x90] sm:$0xff] }
 0x2e4   :  { %852 = vmatpush.msra.mxu2 %v793_v42  ;;  %872 = vmatpush.msra.mxu3 %v809_v1  ;;  %v623_v9 = vmul.f32 %v546_v29, %v1932_v8  ;;  %v624_v21 = vmul.f32 %v545_v23, %v1937_v56  ;;  %v761_v8 = vld [vmem:[#allocation2 + $0x70] sm:$0xff]  ;;  %v770_v35 = vld [vmem:[#allocation2 + $0xb8] sm:$0xff]  ;;  %v796_v1 = vld [vmem:[#allocation2 + $0x188] sm:$0xff] }
 0x2e5   :  { %v777_v56 = vld [vmem:[#allocation2 + $0xf0] sm:$0xff]  ;;  %v766_v42 = vld [vmem:[#allocation2 + $0x98] sm:$0xff]  ;;  %v763_v23 = vld [vmem:[#allocation2 + $0x80] sm:$0xff] }
 0x2e6   :  { %853 = vmatpush.msra.mxu2 %v792_v7  ;;  %873 = vmatpush.msra.mxu3 %v808_v47  ;;  %v795_v7 = vld [vmem:[#allocation2 + $0x180] sm:$0xff]  ;;  %v748_v47 = vld [vmem:[#allocation2 + $0x8] sm:$0xff] }
 0x2e7   :  { %677 = vmatpush.msrb.mxu0 %v623_v9  ;;  %697 = vmatpush.msrb.mxu1 %v624_v21  ;;  %v2562_v29 = vld [vmem:[#allocation10_spill] sm:$0xff]  ;;  %v2563_v9 = vld [vmem:[#allocation9_spill] sm:$0xff]  ;;  %v2564_v21 = vld [vmem:[#allocation11_spill] sm:$0xff] }
 0x2e8   :  { %854 = vmatpush.msra.mxu2 %v791_v40  ;;  %874 = vmatpush.msra.mxu3 %v807_v24 }
 0x2e9   :  { %678 = vmatpush.msrb.mxu0 %v619_v36  ;;  %698 = vmatpush.msrb.mxu1 %v620_v41 }
 0x2ea   :  { %855 = vmatpush.msra.mxu2 %v790_v34  ;;  %875 = vmatpush.msra.mxu3 %v806_v54 }
 0x2eb   :  { %811 = vmatpush.msra.mxu0 %v762_v33  ;;  %831 = vmatpush.msra.mxu1 %v778_v61 }
 0x2ec   :  { %856 = vmatpush.msra.mxu2 %v789_v55  ;;  %876 = vmatpush.msra.mxu3 %v805_v45  ;;  %v894_v55 = vpop.permute.xlu0 %893 }
 0x2ed   :  { %812 = vmatpush.msra.mxu0 %v761_v8  ;;  %832 = vmatpush.msra.mxu1 %v777_v56 }
 0x2ee   :  { %857 = vmatpush.msra.mxu2 %v788_v18  ;;  %877 = vmatpush.msra.mxu3 %v804_v25 }
 0x2ef   :  { %813 = vmatpush.msra.mxu0 %v760_v48  ;;  %833 = vmatpush.msra.mxu1 %v776_v59  ;;  %v900_v48 = vpop.permute.xlu1 %899 }
 0x2f0   :  { %858 = vmatpush.msra.mxu2 %v787_v50  ;;  %878 = vmatpush.msra.mxu3 %v803_v43 }
 0x2f1   :  { %814 = vmatpush.msra.mxu0 %v759_v2  ;;  %834 = vmatpush.msra.mxu1 %v775_v3 }
 0x2f2   :  { %859 = vmatpush.msra.mxu2 %v786_v63  ;;  %879 = vmatpush.msra.mxu3 %v802_v17 }
 0x2f3   :  { %815 = vmatpush.msra.mxu0 %v758_v26  ;;  %835 = vmatpush.msra.mxu1 %v774_v62 }
 0x2f4   :  { %860 = vmatpush.msra.mxu2 %v785_v31  ;;  %880 = vmatpush.msra.mxu3 %v801_v12 }
 0x2f5   :  { %816 = vmatpush.msra.mxu0 %v757_v46  ;;  %836 = vmatpush.msra.mxu1 %v773_v5 }
 0x2f6   :  { %861 = vmatpush.msra.mxu2 %v784_v39  ;;  %881 = vmatpush.msra.mxu3 %v800_v15  ;;  %v69_v39 = vld [vmem:[%s2541_s6 + $0x50] sm:$0xff]  ;;  %v68_v15 = vld [vmem:[%s2541_s6 + $0x48] sm:$0xff] }
 0x2f7   :  { %817 = vmatpush.msra.mxu0 %v756_v44  ;;  %837 = vmatpush.msra.mxu1 %v772_v37  ;;  %v67_v37 = vld [vmem:[%s2541_s6 + $0x40] sm:$0xff] }
 0x2f8   :  { %862 = vmatpush.msra.mxu2 %v783_v49  ;;  %882 = vmatpush.msra.mxu3 %v799_v16  ;;  %v2232_v16 = vld [vmem:[%s2540_s5 + $0x38] sm:$0xff] }
 0x2f9   :  { %818 = vmatpush.msra.mxu0 %v755_v38  ;;  %838 = vmatpush.msra.mxu1 %v771_v11  ;;  %v2226_v38 = vld [vmem:[%s2540_s5 + $0x40] sm:$0xff] }
 0x2fa   :  { %863 = vmatpush.msra.mxu2 %v782_v14  ;;  %883 = vmatpush.msra.mxu3 %v798_v60 }
 0x2fb   :  { %819 = vmatpush.msra.mxu0 %v754_v28  ;;  %839 = vmatpush.msra.mxu1 %v770_v35  ;;  %v2237_v35 = vld [vmem:[%s2540_s5 + $0x30] sm:$0xff] }
 0x2fc   :  { %864 = vmatpush.msra.mxu2 %v781_v10  ;;  %1290 = vmatmul.msk.f32.vlgmr.msrb.gmra.mxu0 %vm353_vm12, %v2170_v6 }
 0x2fd   :  { %820 = vmatpush.msra.mxu0 %v753_v20  ;;  %840 = vmatpush.msra.mxu1 %v769_v57  ;;  %v2243_v57 = vld [vmem:[%s2540_s5 + $0x28] sm:$0xff] }
 0x2fe   :  { %1291 = vmatmul.msk.f32.vlgmr.msrb.gmra.mxu1 %vm353_vm12, %v2170_v6  ;;  %865 = vmatpush.msra.mxu2 %v780_v0  ;;  %v747_v6 = vld [vmem:[#allocation2] sm:$0xff]  ;;  %v2255_v0 = vld [vmem:[%s2540_s5 + $0x18] sm:$0xff] }
 0x2ff   :  { %821 = vmatpush.msra.mxu0 %v752_v32  ;;  %841 = vmatpush.msra.mxu1 %v768_v30  ;;  %v2249_v32 = vld [vmem:[%s2540_s5 + $0x20] sm:$0xff] }
 0x300   :  { %884 = vmatpush.msra.mxu3 %v797_v22  ;;  %866 = vmatpush.msra.mxu2 %v779_v51 }
 0x301   :  { %822 = vmatpush.msra.mxu0 %v751_v58  ;;  %842 = vmatpush.msra.mxu1 %v767_v19  ;;  %v2261_v19 = vld [vmem:[%s2540_s5 + $0x10] sm:$0xff] }
 0x302   :  { %885 = vmatpush.msra.mxu3 %v796_v1  ;;  %867 = vmatmul.f32.vlgmr.msra.gmra.mxu2 %v1514_v13 }
 0x303   :  { %823 = vmatpush.msra.mxu0 %v750_v4  ;;  %843 = vmatpush.msra.mxu1 %v766_v42  ;;  %v2267_v42 = vld [vmem:[%s2540_s5 + $0x8] sm:$0xff] }
 0x304   :  { %886 = vmatpush.msra.mxu3 %v795_v7  ;;  %v2274_v7 = vld [vmem:[%s2540_s5] sm:$0xff] }
 0x305   :  { %824 = vmatpush.msra.mxu0 %v749_v52  ;;  %844 = vmatpush.msra.mxu1 %v765_v27 }
 0x306   :  { %887 = vmatmul.f32.vlgmr.msra.gmra.mxu3 %v2562_v29 }
 0x307   :  { %825 = vmatpush.msra.mxu0 %v748_v47  ;;  %845 = vmatpush.msra.mxu1 %v764_v53 }
 0x309   :  { %826 = vmatpush.msra.mxu0 %v747_v6  ;;  %846 = vmatpush.msra.mxu1 %v763_v23  ;;  %v73_v6 = vld [vmem:[%s2542_s7 + $0x10] sm:$0xff] }
 0x30a   :  { %827 = vmatmul.f32.vlgmr.msra.gmra.mxu0 %v2563_v9  ;;  %847 = vmatmul.f32.vlgmr.msra.gmra.mxu1 %v2564_v21 }
 0x364   :  { %v2202_v24 = vpop.f32.mrf.mxu2  ;;  %v2204_v36 = vpop.f32.mrf.mxu3 }
 0x379   :  { %v2198_v40 = vpop.f32.mrf.mxu0 }
 0x37b   :  { %v2200_v13 = vpop.f32.mrf.mxu1 }
 0x385   :  { %v868_v34 = vpop.f32.mrf.mxu2 }
 0x387   :  { %v828_v41 = vpop.f32.mrf.mxu0  ;;  %v848_v33 = vpop.f32.mrf.mxu1 }
 0x388   :  { %v849_v61 = vadd.f32 %v848_v33, %v828_v41 }
 0x389   :  { %v888_v8 = vpop.f32.mrf.mxu3 }
 0x38a   :  { %v869_v54 = vadd.f32 %v868_v34, %v849_v61 }
 0x38c   :  { %v889_v56 = vadd.f32 %v888_v8, %v869_v54 }
 0x38e   :  { %v896_v45 = vmul.f32 %v894_v55, %v889_v56 }
 0x390   :  { %v902_v59 = vadd.f32 %v900_v48, %v896_v45 }
 0x392   :  { %v903_v18 = vand.u32 2147483647, %v902_v59  ;;  %vm908_vm1 = vcmp.ge.f32.partialorder %v902_v59, 0.0 }
 0x394   :  { %v904_v25 = vsub.f32 0.0, %v903_v18 }
 0x396   :  { %v905_v2 = vmul.f32 1.442695, %v904_v25 }
 0x398   :  { %1364 = vpow2.f32 %v905_v2 }
 0x39e   :  { %v1365_v3 = vpop.eup %1364 }
 0x39f   :  { %v907_v50 = vadd.f32 1.0, %v1365_v3  ;;  %v909_v26 = vmul.f32 %v1365_v3, %v1365_v3 }
 0x3a1   :  { %v911_v43 = vmul.f32 %v907_v50, %v907_v50  ;;  %v910_v63 = vsel %vm908_vm1, %v909_v26, 1.0 }
 0x3a3   :  { %1366 = vrcp.f32 %v911_v43 }
 0x3a9   :  { %v1367_v62 = vpop.eup %1366 }
 0x3aa   :  { %v913_v17 = vmul.f32 %v1367_v62, %v910_v63  ;;  %v70_v62 = vld [vmem:[%s2541_s6 + $0x58] sm:$0xff]  ;;  %v64_v63 = vld [vmem:[%s2541_s6 + $0x28] sm:$0xff] }
 0x3ac   :  { %v916_v46 = vadd.f32 1.0, %v913_v17  ;;  %v914_v5 = vsub.f32 1.0, %v913_v17  ;;  %v1113_v17 = vld [vmem:[%s2538_s3 + $0x1e0] sm:$0xff] }
 0x3ad   :  { %1117 = vmatpush.msrb.mxu2 %v1113_v17  ;;  %v1063_v17 = vld [vmem:[%s2538_s3 + $0x50] sm:$0xff] }
 0x3ae   :  { %1368 = vrcp.f32 %v916_v46  ;;  %v915_v31 = vmul.f32 %v914_v5, %v902_v59  ;;  %v1114_v46 = vld [vmem:[%s2538_s3 + $0x1e8] sm:$0xff]  ;;  %v1115_v5 = vld [vmem:[%s2538_s3 + $0x1f0] sm:$0xff] }
 0x3af   :  { %1137 = vmatpush.msrb.mxu3 %v1114_v46  ;;  %v1112_v46 = vld [vmem:[%s2538_s3 + $0x1d8] sm:$0xff] }
 0x3b4   :  { %v1369_v12 = vpop.eup %1368 }
 0x3b5   :  { %v918_v44 = vmul.f32 %v1369_v12, %v915_v31  ;;  %v1109_v12 = vld [vmem:[%s2538_s3 + $0x1c0] sm:$0xff] }
 0x3b6   :  { %1118 = vmatpush.msrb.mxu2 %v1109_v12  ;;  %v1100_v12 = vld [vmem:[%s2538_s3 + $0x178] sm:$0xff] }
 0x3b7   :  { %929 = vrot.lane.b32.xlu1 %v918_v44, %s1430_s30  ;;  %931 = vrot.lane.b32.xlu0 %v918_v44, %s1431_s9  ;;  %v939_v58 = vmul.f32 %v918_v44, %v2249_v32 }
 0x3b8   :  { %933 = vrot.lane.b32.xlu2 %v918_v44, %s1432_s10 }
 0x3bf   :  { %923 = vrot.lane.b32.xlu1 %v918_v44, %s1433_s12  ;;  %925 = vrot.lane.b32.xlu0 %v918_v44, %s1426_s27 }
 0x3c0   :  { %927 = vrot.lane.b32.xlu2 %v918_v44, %s1425_s26 }
 0x3c7   :  { %946 = vperm.xlu1 %1314, %v67_v37   ;;  %919 = vrot.lane.b32.xlu0 %v918_v44, %s1434_s14  ;;  %v1111_v37 = vld [vmem:[%s2538_s3 + $0x1d0] sm:$0xff] }
 0x3c8   :  { %921 = vrot.lane.b32.xlu2 %v918_v44, %s1420_s11  ;;  %v1110_v44 = vld [vmem:[%s2538_s3 + $0x1c8] sm:$0xff] }
 0x3c9   :  { %1138 = vmatpush.msrb.mxu3 %v1110_v44  ;;  %v1096_v44 = vld [vmem:[%s2538_s3 + $0x158] sm:$0xff] }
 0x3cf   :  { %980 = vperm.xlu0 %1313, %v69_v39   ;;  %v1105_v39 = vld [vmem:[%s2538_s3 + $0x1a0] sm:$0xff] }
 0x3d0   :  { %974 = vperm.xlu2 %1315, %v68_v15   ;;  %v1106_v15 = vld [vmem:[%s2538_s3 + $0x1a8] sm:$0xff]  ;;  %1119 = vmatpush.msrb.mxu2 %v1105_v39  ;;  %v1088_v39 = vld [vmem:[%s2538_s3 + $0x118] sm:$0xff] }
 0x3d1   :  { %1139 = vmatpush.msrb.mxu3 %v1106_v15  ;;  %v1084_v15 = vld [vmem:[%s2538_s3 + $0xf8] sm:$0xff] }
 0x412   :  { %v934_v11 = vpop.permute.xlu2 %933 }
 0x413   :  { %v943_v49 = vmul.f32 %v934_v11, %v2226_v38  ;;  %v1107_v11 = vld [vmem:[%s2538_s3 + $0x1b0] sm:$0xff] }
 0x415   :  { %959 = vmatpush.msrb.mxu0 %v943_v49  ;;  %v1101_v49 = vld [vmem:[%s2538_s3 + $0x180] sm:$0xff] }
 0x416   :  { %1120 = vmatpush.msrb.mxu2 %v1101_v49  ;;  %v1076_v49 = vld [vmem:[%s2538_s3 + $0xb8] sm:$0xff] }
 0x41a   :  { %v928_v28 = vpop.permute.xlu2 %927 }
 0x41b   :  { %v940_v30 = vmul.f32 %v928_v28, %v2243_v57  ;;  %v1102_v28 = vld [vmem:[%s2538_s3 + $0x188] sm:$0xff] }
 0x41c   :  { %1140 = vmatpush.msrb.mxu3 %v1102_v28  ;;  %v1072_v28 = vld [vmem:[%s2538_s3 + $0x98] sm:$0xff] }
 0x422   :  { %v922_v1 = vpop.permute.xlu2 %921 }
 0x423   :  { %v936_v27 = vmul.f32 %v922_v1, %v2267_v42  ;;  %v1095_v1 = vld [vmem:[%s2538_s3 + $0x150] sm:$0xff] }
 0x429   :  { %v930_v14 = vpop.permute.xlu1 %929  ;;  %v932_v60 = vpop.permute.xlu0 %931 }
 0x42a   :  { %v942_v20 = vmul.f32 %v932_v60, %v2232_v16  ;;  %v941_v10 = vmul.f32 %v930_v14, %v2237_v35  ;;  %v975_v21 = vpop.permute.xlu2 %974  ;;  %v1103_v60 = vld [vmem:[%s2538_s3 + $0x190] sm:$0xff] }
 0x42c   :  { %960 = vmatpush.msrb.mxu0 %v942_v20 }
 0x42e   :  { %961 = vmatpush.msrb.mxu0 %v941_v10  ;;  %v1097_v10 = vld [vmem:[%s2538_s3 + $0x160] sm:$0xff] }
 0x42f   :  { %1121 = vmatpush.msrb.mxu2 %v1097_v10  ;;  %v1058_v10 = vld [vmem:[%s2538_s3 + $0x28] sm:$0xff] }
 0x430   :  { %962 = vmatpush.msrb.mxu0 %v940_v30  ;;  %v1098_v30 = vld [vmem:[%s2538_s3 + $0x168] sm:$0xff] }
 0x431   :  { %v924_v22 = vpop.permute.xlu1 %923  ;;  %v926_v51 = vpop.permute.xlu0 %925  ;;  %1141 = vmatpush.msrb.mxu3 %v1098_v30  ;;  %v1059_v30 = vld [vmem:[%s2538_s3 + $0x30] sm:$0xff] }
 0x432   :  { %v938_v4 = vmul.f32 %v926_v51, %v2255_v0  ;;  %963 = vmatpush.msrb.mxu0 %v939_v58  ;;  %v937_v52 = vmul.f32 %v924_v22, %v2261_v19  ;;  %v1099_v22 = vld [vmem:[%s2538_s3 + $0x170] sm:$0xff] }
 0x434   :  { %964 = vmatpush.msrb.mxu0 %v938_v4  ;;  %v1094_v4 = vld [vmem:[%s2538_s3 + $0x148] sm:$0xff] }
 0x435   :  { %1142 = vmatpush.msrb.mxu3 %v1094_v4  ;;  %v1056_v4 = vld [vmem:[%s2538_s3 + $0x18] sm:$0xff] }
 0x436   :  { %965 = vmatpush.msrb.mxu0 %v937_v52 }
 0x438   :  { %966 = vmatpush.msrb.mxu0 %v936_v27  ;;  %v1090_v27 = vld [vmem:[%s2538_s3 + $0x128] sm:$0xff] }
 0x439   :  { %v920_v47 = vpop.permute.xlu0 %919  ;;  %v947_v23 = vpop.permute.xlu1 %946  ;;  %1143 = vmatpush.msrb.mxu3 %v1090_v27 }
 0x43a   :  { %v935_v53 = vmul.f32 %v920_v47, %v2274_v7 }
 0x43c   :  { %967 = vmatpush.msrb.mxu0 %v935_v53  ;;  %v1091_v53 = vld [vmem:[%s2538_s3 + $0x130] sm:$0xff] }
 0x43d   :  { %1294 = vmatmul.msk.f32.vlgmr.msrb.gmra.mxu0 %vm353_vm12, %v73_v6  ;;  %v1086_v6 = vld [vmem:[%s2538_s3 + $0x108] sm:$0xff] }
 0x43e   :  { %1157 = vmatpush.msra.mxu0 %v1115_v5  ;;  %1144 = vmatpush.msrb.mxu3 %v1086_v6  ;;  %v1108_v5 = vld [vmem:[%s2538_s3 + $0x1b8] sm:$0xff]  ;;  %v2566_v6 = vld [vmem:[#allocation7_spill] sm:$0xff] }
 0x440   :  { %1158 = vmatpush.msra.mxu0 %v1111_v37  ;;  %v1092_v37 = vld [vmem:[%s2538_s3 + $0x138] sm:$0xff] }
 0x441   :  { %v981_v33 = vpop.permute.xlu0 %980 }
 0x442   :  { %1159 = vmatpush.msra.mxu0 %v1107_v11  ;;  %v1080_v11 = vld [vmem:[%s2538_s3 + $0xd8] sm:$0xff] }
 0x444   :  { %1160 = vmatpush.msra.mxu0 %v1103_v60  ;;  %v1064_v60 = vld [vmem:[%s2538_s3 + $0x58] sm:$0xff] }
 0x446   :  { %1161 = vmatpush.msra.mxu0 %v1099_v22  ;;  %v1053_v22 = vld [vmem:[%s2538_s3] sm:$0xff] }
 0x448   :  { %1162 = vmatpush.msra.mxu0 %v1095_v1 }
 0x44a   :  { %1163 = vmatpush.msra.mxu0 %v1091_v53  ;;  %v2565_v53 = vld [vmem:[#allocation6_spill] sm:$0xff] }
 0x4ba   :  { %v969_v29 = vpop.f32.mrf.mxu0 }
 0x4bb   :  { %v970_v9 = vadd.f32 %v969_v29, %v947_v23  ;;  %v1087_v29 = vld [vmem:[%s2538_s3 + $0x110] sm:$0xff] }
 0x4bc   :  { %1164 = vmatpush.msra.mxu0 %v1087_v29 }
 0x4bd   :  { %v977_v41 = vmul.f32 %v975_v21, %v970_v9  ;;  %v1081_v21 = vld [vmem:[%s2538_s3 + $0xe0] sm:$0xff] }
 0x4bf   :  { %v983_v61 = vadd.f32 %v981_v33, %v977_v41  ;;  %v1082_v41 = vld [vmem:[%s2538_s3 + $0xe8] sm:$0xff]  ;;  %v1083_v33 = vld [vmem:[%s2538_s3 + $0xf0] sm:$0xff] }
 0x4c0   :  { %1145 = vmatpush.msrb.mxu3 %v1082_v41  ;;  %1165 = vmatpush.msra.mxu0 %v1083_v33 }
 0x4c1   :  { %v984_v34 = vand.u32 2147483647, %v983_v61  ;;  %vm989_vm2 = vcmp.ge.f32.partialorder %v983_v61, 0.0 }
 0x4c3   :  { %v985_v54 = vsub.f32 0.0, %v984_v34  ;;  %v1078_v34 = vld [vmem:[%s2538_s3 + $0xc8] sm:$0xff] }
 0x4c4   :  { %1146 = vmatpush.msrb.mxu3 %v1078_v34 }
 0x4c5   :  { %v986_v8 = vmul.f32 1.442695, %v985_v54 }
 0x4c7   :  { %1370 = vpow2.f32 %v986_v8  ;;  %v1079_v8 = vld [vmem:[%s2538_s3 + $0xd0] sm:$0xff] }
 0x4c8   :  { %1166 = vmatpush.msra.mxu0 %v1079_v8 }
 0x4cd   :  { %v1371_v56 = vpop.eup %1370 }
 0x4ce   :  { %v988_v55 = vadd.f32 1.0, %v1371_v56  ;;  %v990_v48 = vmul.f32 %v1371_v56, %v1371_v56 }
 0x4d0   :  { %v992_v45 = vmul.f32 %v988_v55, %v988_v55  ;;  %v991_v18 = vsel %vm989_vm2, %v990_v48, 1.0  ;;  %v1074_v55 = vld [vmem:[%s2538_s3 + $0xa8] sm:$0xff] }
 0x4d1   :  { %1147 = vmatpush.msrb.mxu3 %v1074_v55 }
 0x4d2   :  { %1372 = vrcp.f32 %v992_v45  ;;  %v1075_v45 = vld [vmem:[%s2538_s3 + $0xb0] sm:$0xff] }
 0x4d3   :  { %1167 = vmatpush.msra.mxu0 %v1075_v45 }
 0x4d8   :  { %v1373_v59 = vpop.eup %1372 }
 0x4d9   :  { %v994_v25 = vmul.f32 %v1373_v59, %v991_v18  ;;  %v1070_v59 = vld [vmem:[%s2538_s3 + $0x88] sm:$0xff] }
 0x4da   :  { %1148 = vmatpush.msrb.mxu3 %v1070_v59 }
 0x4db   :  { %v997_v2 = vadd.f32 1.0, %v994_v25  ;;  %v995_v3 = vsub.f32 1.0, %v994_v25 }
 0x4dd   :  { %1374 = vrcp.f32 %v997_v2  ;;  %v996_v50 = vmul.f32 %v995_v3, %v983_v61  ;;  %v1071_v2 = vld [vmem:[%s2538_s3 + $0x90] sm:$0xff]  ;;  %v1065_v3 = vld [vmem:[%s2538_s3 + $0x60] sm:$0xff] }
 0x4de   :  { %1168 = vmatpush.msra.mxu0 %v1071_v2 }
 0x4e3   :  { %v1375_v43 = vpop.eup %1374 }
 0x4e4   :  { %v2281_v26 = vmul.f32 %v1375_v43, %v996_v50  ;;  %v1066_v50 = vld [vmem:[%s2538_s3 + $0x68] sm:$0xff]  ;;  %v1067_v43 = vld [vmem:[%s2538_s3 + $0x70] sm:$0xff] }
 0x4e5   :  { %1149 = vmatpush.msrb.mxu3 %v1066_v50  ;;  %1169 = vmatpush.msra.mxu0 %v1067_v43 }
 0x4e6   :  { %1010 = vrot.lane.b32.xlu0 %v2281_v26, %s1430_s30  ;;  %1012 = vrot.lane.b32.xlu2 %v2281_v26, %s1431_s9  ;;  %v1020_v61 = vmul.f32 %v2281_v26, %v2249_v32  ;;  %v1073_v32 = vld [vmem:[%s2538_s3 + $0xa0] sm:$0xff] }
 0x4e7   :  { %1014 = vrot.lane.b32.xlu1 %v2281_v26, %s1432_s10  ;;  %1170 = vmatpush.msra.mxu0 %v1063_v17 }
 0x4e9   :  { %1171 = vmatpush.msra.mxu0 %v1059_v30 }
 0x4ee   :  { %1004 = vrot.lane.b32.xlu0 %v2281_v26, %s1433_s12  ;;  %1006 = vrot.lane.b32.xlu2 %v2281_v26, %s1426_s27 }
 0x4ef   :  { %1008 = vrot.lane.b32.xlu1 %v2281_v26, %s1425_s26 }
 0x4f6   :  { %1027 = vperm.xlu0 %1313, %v70_v62   ;;  %1000 = vrot.lane.b32.xlu2 %v2281_v26, %s1434_s14  ;;  %v1061_v62 = vld [vmem:[%s2538_s3 + $0x40] sm:$0xff] }
 0x4f7   :  { %1002 = vrot.lane.b32.xlu1 %v2281_v26, %s1420_s11 }
 0x4ff   :  { %657 = vperm.xlu1 %1314, %v64_v63   ;;  %v1116_v63 = vld [vmem:[%s2538_s3 + $0x1f8] sm:$0xff] }
 0x540   :  { %v1013_v31 = vpop.permute.xlu2 %1012 }
 0x541   :  { %v1023_v51 = vmul.f32 %v1013_v31, %v2232_v16  ;;  %v1089_v16 = vld [vmem:[%s2538_s3 + $0x120] sm:$0xff]  ;;  %v1104_v31 = vld [vmem:[%s2538_s3 + $0x198] sm:$0xff] }
 0x548   :  { %v1007_v47 = vpop.permute.xlu2 %1006 }
 0x549   :  { %v1019_v56 = vmul.f32 %v1007_v47, %v2255_v0  ;;  %v1069_v0 = vld [vmem:[%s2538_s3 + $0x80] sm:$0xff] }
 0x550   :  { %v1001_v18 = vpop.permute.xlu2 %1000 }
 0x551   :  { %v1016_v26 = vmul.f32 %v1001_v18, %v2274_v7  ;;  %v1062_v7 = vld [vmem:[%s2538_s3 + $0x48] sm:$0xff] }
 0x552   :  { %1150 = vmatpush.msrb.mxu3 %v1062_v7 }
 0x554   :  { %1151 = vmatpush.msrb.mxu3 %v1058_v10 }
 0x558   :  { %v1011_v58 = vpop.permute.xlu0 %1010 }
 0x559   :  { %v1015_v14 = vpop.permute.xlu1 %1014  ;;  %v1022_v52 = vmul.f32 %v1011_v58, %v2237_v35  ;;  %v1085_v35 = vld [vmem:[%s2538_s3 + $0x100] sm:$0xff]  ;;  %v1060_v58 = vld [vmem:[%s2538_s3 + $0x38] sm:$0xff] }
 0x55a   :  { %v1024_v20 = vmul.f32 %v1015_v14, %v2226_v38  ;;  %v1093_v38 = vld [vmem:[%s2538_s3 + $0x140] sm:$0xff]  ;;  %v1068_v14 = vld [vmem:[%s2538_s3 + $0x78] sm:$0xff] }
 0x55b   :  { %1122 = vmatpush.msrb.mxu2 %v1093_v38  ;;  %v1055_v38 = vld [vmem:[%s2538_s3 + $0x10] sm:$0xff] }
 0x55c   :  { %1040 = vmatpush.msrb.mxu1 %v1024_v20  ;;  %v1057_v20 = vld [vmem:[%s2538_s3 + $0x20] sm:$0xff]  ;;  %1172 = vmatpush.msra.mxu0 %v1055_v38 }
 0x55d   :  { %1123 = vmatpush.msrb.mxu2 %v1089_v16 }
 0x55e   :  { %1041 = vmatpush.msrb.mxu1 %v1023_v51  ;;  %v1054_v51 = vld [vmem:[%s2538_s3 + $0x8] sm:$0xff] }
 0x55f   :  { %1124 = vmatpush.msrb.mxu2 %v1085_v35  ;;  %1152 = vmatpush.msrb.mxu3 %v1054_v51 }
 0x560   :  { %1042 = vmatpush.msrb.mxu1 %v1022_v52  ;;  %v1005_v54 = vpop.permute.xlu0 %1004 }
 0x561   :  { %v1009_v23 = vpop.permute.xlu1 %1008  ;;  %1125 = vmatpush.msrb.mxu2 %v1081_v21  ;;  %v1018_v48 = vmul.f32 %v1005_v54, %v2261_v19  ;;  %v2568_v54 = vld [vmem:[#allocation8_spill] sm:$0xff] }
 0x562   :  { %v1021_v9 = vmul.f32 %v1009_v23, %v2243_v57  ;;  %v1077_v57 = vld [vmem:[%s2538_s3 + $0xc0] sm:$0xff] }
 0x563   :  { %1126 = vmatpush.msrb.mxu2 %v1077_v57  ;;  %v2567_v57 = vld [vmem:[#allocation5_spill] sm:$0xff] }
 0x564   :  { %1043 = vmatpush.msrb.mxu1 %v1021_v9 }
 0x565   :  { %1127 = vmatpush.msrb.mxu2 %v1073_v32 }
 0x566   :  { %1044 = vmatpush.msrb.mxu1 %v1020_v61 }
 0x567   :  { %1128 = vmatpush.msrb.mxu2 %v1069_v0 }
 0x568   :  { %1045 = vmatpush.msrb.mxu1 %v1019_v56  ;;  %v1028_v1 = vpop.permute.xlu0 %1027 }
 0x569   :  { %v1003_v25 = vpop.permute.xlu1 %1002  ;;  %1129 = vmatpush.msrb.mxu2 %v1065_v3 }
 0x56a   :  { %v1017_v19 = vmul.f32 %v1003_v25, %v2267_v42  ;;  %1046 = vmatpush.msrb.mxu1 %v1018_v48  ;;  %v74_v42 = vld [vmem:[%s2542_s7 + $0x18] sm:$0xff] }
 0x56b   :  { %1130 = vmatpush.msrb.mxu2 %v1061_v62 }
 0x56c   :  { %1047 = vmatpush.msrb.mxu1 %v1017_v19 }
 0x56d   :  { %1131 = vmatpush.msrb.mxu2 %v1057_v20 }
 0x56e   :  { %1048 = vmatpush.msrb.mxu1 %v1016_v26 }
 0x56f   :  { %1295 = vmatmul.msk.f32.vlgmr.msrb.gmra.mxu1 %vm353_vm12, %v74_v42  ;;  %1132 = vmatpush.msrb.mxu2 %v1053_v22 }
 0x570   :  { %1177 = vmatpush.msra.mxu1 %v1116_v63 }
 0x572   :  { %1178 = vmatpush.msra.mxu1 %v1112_v46 }
 0x574   :  { %1179 = vmatpush.msra.mxu1 %v1108_v5 }
 0x576   :  { %1180 = vmatpush.msra.mxu1 %v1104_v31 }
 0x578   :  { %1181 = vmatpush.msra.mxu1 %v1100_v12 }
 0x57a   :  { %1182 = vmatpush.msra.mxu1 %v1096_v44 }
 0x57c   :  { %1183 = vmatpush.msra.mxu1 %v1092_v37 }
 0x57e   :  { %1184 = vmatpush.msra.mxu1 %v1088_v39 }
 0x580   :  { %1185 = vmatpush.msra.mxu1 %v1084_v15 }
 0x582   :  { %1186 = vmatpush.msra.mxu1 %v1080_v11 }
 0x584   :  { %1187 = vmatpush.msra.mxu1 %v1076_v49 }
 0x586   :  { %1188 = vmatpush.msra.mxu1 %v1072_v28 }
 0x588   :  { %1189 = vmatpush.msra.mxu1 %v1068_v14 }
 0x58a   :  { %1190 = vmatpush.msra.mxu1 %v1064_v60 }
 0x58c   :  { %1191 = vmatpush.msra.mxu1 %v1060_v58 }
 0x58e   :  { %1192 = vmatpush.msra.mxu1 %v1056_v4 }
 0x5ec   :  { %v1050_v52 = vpop.f32.mrf.mxu1 }
 0x5ed   :  { %v1051_v16 = vadd.f32 %v1050_v52, %v1028_v1 }
 0x5ef   :  { %1133 = vmatmul.f32.vlgmr.msrb.gmra.mxu2 %v1051_v16  ;;  %1153 = vmatmul.f32.vlgmr.msrb.gmra.mxu3 %v1051_v16 }
 0x5f0   :  { %1173 = vmatmul.f32.vlgmr.msra.gmra.mxu0 %v1051_v16  ;;  %1193 = vmatmul.f32.vlgmr.msra.gmra.mxu1 %v1051_v16 }
 0x66d   :  { %v1174_v27 = vpop.f32.mrf.mxu0  ;;  %v1194_v47 = vpop.f32.mrf.mxu1 }
 0x66e   :  { %v1199_v35 = vmul.f32 %v1174_v27, %v2565_v53  ;;  %v1200_v23 = vmul.f32 %v1194_v47, %v2566_v6 }
 0x670   :  { %v1213_v29 = vrot.slane %v1199_v35, 4  ;;  %v1219_v9 = vrot.slane %v1200_v23, 4 }
 0x672   :  { %v1214_v21 = vmax.f32 %v1199_v35, %v1213_v29  ;;  %v1220_v41 = vmax.f32 %v1200_v23, %v1219_v9  ;;  %v1134_v33 = vpop.f32.mrf.mxu2  ;;  %v1154_v61 = vpop.f32.mrf.mxu3 }
 0x673   :  { %v1197_v34 = vmul.f32 %v1134_v33, %v2567_v57  ;;  %v1198_v8 = vmul.f32 %v1154_v61, %v2568_v54  ;;  %v658_v61 = vpop.permute.xlu1 %657 }
 0x674   :  { %v1215_v56 = vrot.slane %v1214_v21, 2  ;;  %v1221_v32 = vrot.slane %v1220_v41, 2 }
 0x675   :  { %v1201_v55 = vrot.slane %v1197_v34, 4  ;;  %v1207_v45 = vrot.slane %v1198_v8, 4 }
 0x676   :  { %v1216_v48 = vmax.f32 %v1214_v21, %v1215_v56  ;;  %v1222_v0 = vmax.f32 %v1220_v41, %v1221_v32  ;;  %v721_v32 = vadd.f32 %v2202_v24, %v658_v61 }
 0x677   :  { %v1202_v59 = vmax.f32 %v1197_v34, %v1201_v55  ;;  %v1208_v18 = vmax.f32 %v1198_v8, %v1207_v45  ;;  %v741_v45 = vadd.f32 %v2204_v36, %v658_v61 }
 0x678   :  { %v1217_v25 = vrot.slane %v1216_v48, 1  ;;  %v1223_v2 = vrot.slane %v1222_v0, 1 }
 0x679   :  { %v1203_v19 = vrot.slane %v1202_v59, 2  ;;  %v1209_v3 = vrot.slane %v1208_v18, 2 }
 0x67a   :  { %v1218_v50 = vmax.f32 %v1216_v48, %v1217_v25  ;;  %v1224_v43 = vmax.f32 %v1222_v0, %v1223_v2  ;;  %v681_v2 = vadd.f32 %v2198_v40, %v658_v61 }
 0x67b   :  { %v1204_v26 = vmax.f32 %v1202_v59, %v1203_v19  ;;  %v1210_v42 = vmax.f32 %v1208_v18, %v1209_v3  ;;  %v745_v18 = vmul.f32 %v721_v32, %v2565_v53  ;;  %v746_v19 = vmul.f32 %v741_v45, %v2566_v6 }
 0x67c   :  { %v1227_v62 = vsub.f32 %v1199_v35, %v1218_v50  ;;  %v1228_v63 = vsub.f32 %v1200_v23, %v1224_v43  ;;  %v701_v43 = vadd.f32 %v2200_v13, %v658_v61  ;;  %v743_v53 = vmul.f32 %v681_v2, %v2567_v57 }
 0x67d   :  { %v1205_v7 = vrot.slane %v1204_v26, 1  ;;  %v1211_v17 = vrot.slane %v1210_v42, 1 }
 0x67e   :  { %v1233_v46 = vmul.f32 1.442695, %v1227_v62  ;;  %v1235_v5 = vmul.f32 1.442695, %v1228_v63  ;;  %v744_v6 = vmul.f32 %v701_v43, %v2568_v54 }
 0x67f   :  { %v1206_v31 = vmax.f32 %v1204_v26, %v1205_v7  ;;  %v1212_v12 = vmax.f32 %v1210_v42, %v1211_v17 }
 0x680   :  { %1376 = vpow2.f32 %v1233_v46 }
 0x681   :  { %1378 = vpow2.f32 %v1235_v5  ;;  %v1225_v44 = vsub.f32 %v1197_v34, %v1206_v31  ;;  %v1226_v37 = vsub.f32 %v1198_v8, %v1212_v12 }
 0x683   :  { %v1229_v39 = vmul.f32 1.442695, %v1225_v44  ;;  %v1231_v15 = vmul.f32 1.442695, %v1226_v37 }
 0x685   :  { %1380 = vpow2.f32 %v1229_v39 }
 0x686   :  { %v1377_v11 = vpop.eup %1376  ;;  %1382 = vpow2.f32 %v1231_v15 }
 0x687   :  { %v1379_v49 = vpop.eup %1378  ;;  %v1249_v28 = vrot.slane %v1377_v11, 4 }
 0x688   :  { %v1255_v14 = vrot.slane %v1379_v49, 4 }
 0x689   :  { %v1250_v60 = vadd.f32 %v1377_v11, %v1249_v28 }
 0x68a   :  { %v1256_v20 = vadd.f32 %v1379_v49, %v1255_v14 }
 0x68b   :  { %v1381_v10 = vpop.eup %1380  ;;  %v1251_v30 = vrot.slane %v1250_v60, 2 }
 0x68c   :  { %v1383_v58 = vpop.eup %1382  ;;  %v1257_v22 = vrot.slane %v1256_v20, 2  ;;  %v1237_v51 = vrot.slane %v1381_v10, 4 }
 0x68d   :  { %v1252_v38 = vadd.f32 %v1251_v30, %v1250_v60  ;;  %v1243_v4 = vrot.slane %v1383_v58, 4 }
 0x68e   :  { %v1258_v1 = vadd.f32 %v1257_v22, %v1256_v20  ;;  %v1238_v52 = vadd.f32 %v1381_v10, %v1237_v51 }
 0x68f   :  { %v1253_v16 = vrot.slane %v1252_v38, 1  ;;  %v1244_v27 = vadd.f32 %v1383_v58, %v1243_v4 }
 0x690   :  { %v1259_v47 = vrot.slane %v1258_v1, 1  ;;  %v1239_v35 = vrot.slane %v1238_v52, 2 }
 0x691   :  { %v1254_v23 = vadd.f32 %v1253_v16, %v1252_v38  ;;  %v1245_v29 = vrot.slane %v1244_v27, 2 }
 0x692   :  { %v1260_v9 = vadd.f32 %v1259_v47, %v1258_v1  ;;  %v1240_v21 = vadd.f32 %v1239_v35, %v1238_v52 }
 0x693   :  { %1384 = vrcp.f32 %v1254_v23  ;;  %v1246_v41 = vadd.f32 %v1245_v29, %v1244_v27 }
 0x694   :  { %1386 = vrcp.f32 %v1260_v9  ;;  %v1241_v33 = vrot.slane %v1240_v21, 1 }
 0x695   :  { %v1247_v34 = vrot.slane %v1246_v41, 1 }
 0x696   :  { %v1242_v8 = vadd.f32 %v1241_v33, %v1240_v21 }
 0x697   :  { %v1248_v56 = vadd.f32 %v1247_v34, %v1246_v41 }
 0x698   :  { %1388 = vrcp.f32 %v1242_v8 }
 0x699   :  { %v1385_v55 = vpop.eup %1384  ;;  %1390 = vrcp.f32 %v1248_v56 }
 0x69a   :  { %v1387_v48 = vpop.eup %1386  ;;  %v1267_v0 = vmul.f32 %v1385_v55, %v1377_v11 }
 0x69b   :  { %v1268_v59 = vmul.f32 %v1387_v48, %v1379_v49 }
 0x69c   :  { %v1271_v25 = vadd.f32 1.0, %v1267_v0 }
 0x69d   :  { %v1272_v3 = vadd.f32 1.0, %v1268_v59 }
 0x69e   :  { %v1389_v50 = vpop.eup %1388  ;;  %v1275_v24 = vmul.f32 %v1271_v25, %v745_v18 }
 0x69f   :  { %v1391_v26 = vpop.eup %1390  ;;  %v1276_v42 = vmul.f32 %v1272_v3, %v746_v19  ;;  %v1265_v62 = vmul.f32 %v1389_v50, %v1381_v10 }
 0x6a0   :  { %1279 = vst [vmem:[%s2543_s8 + $0x10] sm:$0xff] %v1275_v24  ;;  %v1266_v36 = vmul.f32 %v1391_v26, %v1383_v58 }
 0x6a1   :  { %1280 = vst [vmem:[%s2543_s8 + $0x18] sm:$0xff] %v1276_v42  ;;  %v1269_v40 = vadd.f32 1.0, %v1265_v62 }
 0x6a2   :  { %v1270_v63 = vadd.f32 1.0, %v1266_v36 }
 0x6a3   :  { %v1273_v13 = vmul.f32 %v1269_v40, %v743_v53 }
 0x6a4   :  { %v1274_v7 = vmul.f32 %v1270_v63, %v744_v6 }
 0x6a5   :  { %1277 = vst [vmem:[%s2543_s8] sm:$0xff] %v1273_v13 }
 0x6a6   :  { %1278 = vst [vmem:[%s2543_s8 + $0x8] sm:$0xff] %v1274_v7 }
 0x6a7   :  { %1285 = vsyncpa [#allocation3], 1 }

</bundles_post_ra>
